<compile_context>
chip_gen: v6e
topology: v6e:2x2x1
jax: 0.10.0
libtpu: 0.0.40
codegen_flags: <defaults>
</compile_context>

<pallas_src>
import functools

import jax
import jax.numpy as jnp
from jax import lax
from jax.experimental import pallas as pl
from jax.experimental.pallas import tpu as pltpu


def _round_up(x, m):
    return ((x + m - 1) // m) * m


def _attention_kernel(*refs, num_groups, group_size, head_dim,
                      has_out_proj, use_mask, per_head_mask, share_kv):
    refs = list(refs)
    q_ref = refs.pop(0)                       # (1, tq, D)  bf16
    k_ref = refs.pop(0)                       # (1, Sk, D)  bf16
    v_ref = None if share_kv else refs.pop(0)
    gamma_ref = refs.pop(0)                   # (1, D) f32
    beta_ref = refs.pop(0)                    # (1, D) f32
    wq_ref = refs.pop(0)                      # (NG, D, Gd) bf16  (scale folded)
    bq_ref = refs.pop(0)                      # (NG, 1, Gd) f32
    wk_ref = refs.pop(0)
    bk_ref = refs.pop(0)
    wv_ref = refs.pop(0)
    bv_ref = refs.pop(0)
    if has_out_proj:
        wo_ref = refs.pop(0)                  # (NG, Gd, Dout_p) bf16
        bo_ref = refs.pop(0)                  # (1, Dout_p) f32
    bias_ref = refs.pop(0) if use_mask else None   # (1, 1|G, tq, Sk) bf16
    o_ref = refs.pop(0)
    qn_s = refs.pop(0)                        # (tq, D) bf16    q LayerNorm
    kproj_s = refs.pop(0)                     # (NG, G, Sk, Dh) bf16
    vproj_s = refs.pop(0)                     # (NG, G, Sk, Dh) bf16

    qi = pl.program_id(1)
    g = pl.program_id(2)
    f32, bf16 = jnp.float32, jnp.bfloat16
    G, Dh = group_size, head_dim

    gamma = gamma_ref[...]
    beta = beta_ref[...]

    def layernorm(x_bf16):                    # f32 statistics, f32 result
        x = x_bf16.astype(f32)
        mean = jnp.mean(x, axis=-1, keepdims=True)
        var = jnp.mean(jnp.square(x - mean), axis=-1, keepdims=True)
        return (x - mean) * lax.rsqrt(var + 1e-5) * gamma + beta

    # ---- Q LayerNorm: once per (batch, q-tile); all head groups reuse it. ----
    @pl.when(g == 0)
    def _q_layernorm():
        qn_s[...] = layernorm(q_ref[0]).astype(bf16)

    # ---- K/V LayerNorm + ALL head projections: once per batch.           ----
    # Only the batch grid axis is "parallel", so every core starts each batch
    # it owns at (qi==0, g==0) -> this guard is megacore-safe on v7x.
    @pl.when(jnp.logical_and(qi == 0, g == 0))
    def _kv_cache_fill():
        kn = layernorm(k_ref[0]).astype(bf16)                     # (Sk, D)
        vn = kn if share_kv else layernorm(v_ref[0]).astype(bf16)
        for gg in range(num_groups):                              # static loop
            kh = (jnp.dot(kn, wk_ref[gg], preferred_element_type=f32)
                  + bk_ref[gg]).astype(bf16)                      # (Sk, Gd)
            vh = (jnp.dot(vn, wv_ref[gg], preferred_element_type=f32)
                  + bv_ref[gg]).astype(bf16)
            for hh in range(G):                                   # static loop
                kproj_s[gg, hh] = kh[:, hh * Dh:(hh + 1) * Dh]
                vproj_s[gg, hh] = vh[:, hh * Dh:(hh + 1) * Dh]

    # ---- per-step work: wide Q projection, per-head attention, out-proj. ----
    qn = qn_s[...]                                                # (tq, D) bf16
    qh = (jnp.dot(qn, wq_ref[g], preferred_element_type=f32)
          + bq_ref[g]).astype(bf16)                               # (tq, Gd)

    if use_mask:
        if per_head_mask:
            bias_g = bias_ref[0].astype(f32)                      # (G, tq, Sk)
        else:
            bias_1 = bias_ref[0, 0].astype(f32)                   # (tq, Sk)

    outs = []
    for hh in range(G):                                           # static loop
        q_h = qh[:, hh * Dh:(hh + 1) * Dh]                        # (tq, Dh)
        k_h = kproj_s[g, hh]                                      # (Sk, Dh)
        v_h = vproj_s[g, hh]                                      # (Sk, Dh)
        # scores: contract head_dim of both operands (no explicit transpose)
        s = lax.dot_general(q_h, k_h, (((1,), (1,)), ((), ())),
                            preferred_element_type=f32)           # (tq, Sk)
        if use_mask:
            s = s + (bias_g[hh] if per_head_mask else bias_1)
        m = jnp.max(s, axis=-1, keepdims=True)
        e = jnp.exp(s - m)
        l = jnp.sum(e, axis=-1, keepdims=True)                    # (tq, 1)
        o_h = jnp.dot(e.astype(bf16), v_h, preferred_element_type=f32)
        # deferred normalization: scale the (tq, Dh) result, not (tq, Sk) probs
        outs.append(o_h * pl.reciprocal(l, approx=True))
    out_g = jnp.concatenate(outs, axis=-1) if G > 1 else outs[0]  # (tq, Gd) f32

    if has_out_proj:
        # group's contribution to the output projection: full Gd-wide MXU op
        contrib = jnp.dot(out_g.astype(bf16), wo_ref[g],
                          preferred_element_type=f32)             # (tq, Dout_p)

        @pl.when(g == 0)
        def _init():
            o_ref[0] = contrib + bo_ref[...]

        @pl.when(g > 0)
        def _acc():
            o_ref[0] = o_ref[0] + contrib
    else:
        # Identity to_out: each head group writes its own lane-dense block.
        o_ref[0, 0] = out_g


def init_params(key, dim_in, head_dim, num_heads):
    inner = head_dim * num_heads
    ks = jax.random.split(key, 10)
    return {
        "gamma": jnp.ones((dim_in,), jnp.float32)
                 + 0.1 * jax.random.normal(ks[0], (dim_in,), jnp.float32),
        "beta":  0.1 * jax.random.normal(ks[1], (dim_in,), jnp.float32),
        "wq": 0.1 * jax.random.normal(ks[2], (dim_in, inner), jnp.float32),
        "bq": 0.1 * jax.random.normal(ks[3], (inner,), jnp.float32),
        "wk": 0.1 * jax.random.normal(ks[4], (dim_in, inner), jnp.float32),
        "bk": 0.1 * jax.random.normal(ks[5], (inner,), jnp.float32),
        "wv": 0.1 * jax.random.normal(ks[6], (dim_in, inner), jnp.float32),
        "bv": 0.1 * jax.random.normal(ks[7], (inner,), jnp.float32),
        "wo": 0.1 * jax.random.normal(ks[8], (inner, dim_in), jnp.float32),
        "bo": 0.1 * jax.random.normal(ks[9], (dim_in,), jnp.float32),
    }


def attention_forward(q, k, v, params, *, head_dim, num_heads, mask=None):
    B, Sq, D = q.shape
    Sk = k.shape[1]
    inner = head_dim * num_heads
    scale = head_dim ** (-0.5)
    has_out_proj = not (num_heads != 1 and head_dim == D)
    share_kv = k is v                      # decided on the ORIGINAL arrays
    use_mask = mask is not None
    f32, bf16 = jnp.float32, jnp.bfloat16

    # ---- head grouping: G*head_dim lanes per projection matmul (<=256). ----
    G = 1
    for d in range(min(num_heads, 8), 0, -1):
        if num_heads % d == 0 and d * head_dim <= 256:
            G = d
            break
    NG = num_heads // G
    Gd = G * head_dim

    # ---- q tile: fixed 128 rows (pad Sq), or whole 8-aligned Sq if small. ----
    if Sq >= 128:
        tq = 128
        Sq_p = _round_up(Sq, tq)
    else:
        tq = _round_up(Sq, 8)
        Sq_p = tq
    nq = Sq_p // tq

    # ---- wrapper-side prep: bf16 inputs, head-grouped bf16 weights. ----
    q_in = q.astype(bf16)
    if Sq_p != Sq:
        q_in = jnp.pad(q_in, ((0, 0), (0, Sq_p - Sq), (0, 0)))
    args = [q_in, k.astype(bf16)]
    if not share_kv:
        args.append(v.astype(bf16))

    gamma = params["gamma"].reshape(1, D).astype(f32)
    beta = params["beta"].reshape(1, D).astype(f32)

    def group_w(w):   # (D, H*Dh) -> (NG, D, Gd), bf16
        return jnp.transpose(w.reshape(D, NG, Gd), (1, 0, 2)).astype(bf16)

    def group_b(b):   # (H*Dh,) -> (NG, 1, Gd), f32
        return b.reshape(NG, 1, Gd).astype(f32)

    # fold 1/sqrt(head_dim) into the Q projection (one-time, wrapper side)
    wq = group_w(params["wq"] * scale)
    bq = group_b(params["bq"] * scale)
    wk = group_w(params["wk"])
    bk = group_b(params["bk"])
    wv = group_w(params["wv"])
    bv = group_b(params["bv"])
    args += [gamma, beta, wq, bq, wk, bk, wv, bv]

    const2 = lambda b, qi, g: (0, 0)
    const3 = lambda b, qi, g: (0, 0, 0)
    in_specs = [
        pl.BlockSpec((1, tq, D), lambda b, qi, g: (b, qi, 0)),    # q tile
        pl.BlockSpec((1, Sk, D), lambda b, qi, g: (b, 0, 0)),     # k (full seq)
    ]
    if not share_kv:
        in_specs.append(pl.BlockSpec((1, Sk, D), lambda b, qi, g: (b, 0, 0)))
    # weights / biases: constant index maps -> DMA'd once, VMEM-resident
    in_specs += [
        pl.BlockSpec((1, D), const2),              # gamma
        pl.BlockSpec((1, D), const2),              # beta
        pl.BlockSpec((NG, D, Gd), const3),         # wq
        pl.BlockSpec((NG, 1, Gd), const3),         # bq
        pl.BlockSpec((NG, D, Gd), const3),         # wk
        pl.BlockSpec((NG, 1, Gd), const3),         # bk
        pl.BlockSpec((NG, D, Gd), const3),         # wv
        pl.BlockSpec((NG, 1, Gd), const3),         # bv
    ]

    if has_out_proj:
        dim_out = D
        dim_out_p = max(_round_up(dim_out, 128), 128)   # lane-dense output slab
        wo = params["wo"]
        bo = params["bo"]
        if dim_out_p != dim_out:
            wo = jnp.pad(wo, ((0, 0), (0, dim_out_p - dim_out)))
            bo = jnp.pad(bo, (0, dim_out_p - dim_out))
        wo = wo.reshape(NG, Gd, dim_out_p).astype(bf16)
        bo = bo.reshape(1, dim_out_p).astype(f32)
        in_specs += [pl.BlockSpec((NG, Gd, dim_out_p), const3),
                     pl.BlockSpec((1, dim_out_p), const2)]
        args += [wo, bo]
        out_shape = jax.ShapeDtypeStruct((B, Sq_p, dim_out_p), f32)
        out_spec = pl.BlockSpec((1, tq, dim_out_p), lambda b, qi, g: (b, qi, 0))
    else:
        out_shape = jax.ShapeDtypeStruct((B, NG, Sq_p, Gd), f32)
        out_spec = pl.BlockSpec((1, 1, tq, Gd), lambda b, qi, g: (b, g, qi, 0))

    per_head_mask = False
    if use_mask:
        m = jnp.asarray(mask)
        per_head_mask = (m.ndim >= 3 and m.shape[-3] == num_heads
                         and num_heads > 1)
        m4 = jnp.broadcast_to(m, (B, num_heads, Sq, Sk))
        if not per_head_mask:
            m4 = m4[:, :1]                                   # (B, 1, Sq, Sk)
        # additive bias, bf16 (half the HBM traffic of int32, add-only in-kernel)
        bias = jnp.where(m4 == 0, jnp.float32(-1e20),
                         jnp.float32(0.0)).astype(bf16)
        if Sq_p != Sq:
            bias = jnp.pad(bias, ((0, 0), (0, 0), (0, Sq_p - Sq), (0, 0)))
        hg = G if per_head_mask else 1
        mask_idx = ((lambda b, qi, g: (b, g, qi, 0)) if per_head_mask
                    else (lambda b, qi, g: (b, 0, qi, 0)))
        in_specs.append(pl.BlockSpec((1, hg, tq, Sk), mask_idx))
        args.append(bias)

    scratch = [
        pltpu.VMEM((tq, D), bf16),                     # q LayerNorm cache
        pltpu.VMEM((NG, G, Sk, head_dim), bf16),       # K head-projection cache
        pltpu.VMEM((NG, G, Sk, head_dim), bf16),       # V head-projection cache
    ]

    kernel = functools.partial(
        _attention_kernel, num_groups=NG, group_size=G, head_dim=head_dim,
        has_out_proj=has_out_proj, use_mask=use_mask,
        per_head_mask=per_head_mask, share_kv=share_kv)

    out = pl.pallas_call(
        kernel,
        out_shape=out_shape,
        grid=(B, nq, NG),
        in_specs=in_specs,
        out_specs=out_spec,
        scratch_shapes=scratch,
        compiler_params=pltpu.CompilerParams(
            # Only the batch axis is "parallel": keeps the (qi==0, g==0) K/V
            # projection cache megacore-safe on v7x (each core starts every
            # batch it owns at qi=0, g=0).  parallel-vs-arbitrary is a no-op
            # on v5e/v6e (single TensorCore).
            dimension_semantics=("parallel", "arbitrary", "arbitrary"),
            # 48 MiB: headroom under v7x's 64 MiB physical VMEM, and a raise
            # over the default scoped limit on v5e/v6e.
            vmem_limit_bytes=48 * 1024 * 1024,
        ),
    )(*args)

    if has_out_proj:
        if Sq_p != Sq or dim_out_p != dim_out:
            out = out[:, :Sq, :dim_out]
        return out
    # identity to_out: (B, NG, Sq_p, Gd) -> (B, Sq, H*Dh)
    out = jnp.transpose(out, (0, 2, 1, 3)).reshape(B, Sq_p, inner)
    return out[:, :Sq] if Sq_p != Sq else out


def attention_ref(q, k, v, params, *, head_dim, num_heads, mask=None):
    """Pure-JAX f32 reference mirroring the PyTorch forward exactly."""
    D = q.shape[-1]
    inner = head_dim * num_heads
    proj_out = not (num_heads != 1 and head_dim == D)

    def ln(x):
        mean = x.mean(-1, keepdims=True)
        var = ((x - mean) ** 2).mean(-1, keepdims=True)
        return (x - mean) / jnp.sqrt(var + 1e-5) * params["gamma"] + params["beta"]

    qp = ln(q) @ params["wq"] + params["bq"]
    kp = ln(k) @ params["wk"] + params["bk"]
    vp = ln(v) @ params["wv"] + params["bv"]
    B, Sq, _ = qp.shape
    Sk = kp.shape[1]
    qh = qp.reshape(B, Sq, num_heads, head_dim).transpose(0, 2, 1, 3)
    kh = kp.reshape(B, Sk, num_heads, head_dim).transpose(0, 2, 1, 3)
    vh = vp.reshape(B, Sk, num_heads, head_dim).transpose(0, 2, 1, 3)
    dots = jnp.einsum("bhqd,bhkd->bhqk", qh, kh)
    if mask is not None:
        mask_b = jnp.broadcast_to(mask, dots.shape)
        dots = jnp.where(mask_b == 0, jnp.float32(-1e20), dots)
    dots = dots * (head_dim ** -0.5)
    attn = jax.nn.softmax(dots, axis=-1)
    out = jnp.einsum("bhqk,bhkd->bhqd", attn, vh)
    out = out.transpose(0, 2, 1, 3).reshape(B, Sq, inner)
    if proj_out:
        return out @ params["wo"] + params["bo"]
    return out


if __name__ == "__main__":
    B, S, dim_in = 2, 8, 32
    num_heads, head_dim = 4, 16

    key = jax.random.PRNGKey(0)
    kq, kk, kv, kp, km, kp2 = jax.random.split(key, 6)
    q = jax.random.normal(kq, (B, S, dim_in), jnp.float32)
    k = jax.random.normal(kk, (B, S, dim_in), jnp.float32)
    v = jax.random.normal(kv, (B, S, dim_in), jnp.float32)
    params = init_params(kp, dim_in, head_dim, num_heads)

    tol = dict(atol=4e-2, rtol=4e-2)   # bf16 inputs / bf16 MXU vs f32 reference

    # 1) cross-attention, no mask, with output projection
    out = jax.block_until_ready(
        attention_forward(q, k, v, params, head_dim=head_dim,
                          num_heads=num_heads))
    ref = attention_ref(q, k, v, params, head_dim=head_dim,
                        num_heads=num_heads)
    assert out.shape == (B, S, dim_in)
    assert jnp.allclose(out, ref, **tol), "no-mask mismatch"

    # 2) masked attention with shared K/V tensor (share_kv fast path)
    mask = (jax.random.uniform(km, (B, 1, S, S)) > 0.3).astype(jnp.float32)
    out_m = jax.block_until_ready(
        attention_forward(q, k, k, params, head_dim=head_dim,
                          num_heads=num_heads, mask=mask))
    ref_m = attention_ref(q, k, k, params, head_dim=head_dim,
                          num_heads=num_heads, mask=mask)
    assert jnp.allclose(out_m, ref_m, **tol), "masked mismatch"

    # 3) identity to_out path (num_heads != 1 and head_dim == dim_in)
    params2 = init_params(kp2, dim_in, dim_in, 2)
    out_i = jax.block_until_ready(
        attention_forward(q, k, v, params2, head_dim=dim_in, num_heads=2))
    ref_i = attention_ref(q, k, v, params2, head_dim=dim_in, num_heads=2)
    assert out_i.shape == (B, S, 2 * dim_in)
    assert jnp.allclose(out_i, ref_i, **tol), "identity-proj mismatch"

    print("KERNEL_OK")
</pallas_src>

<mosaic_0001>
module attributes {stable_mosaic.version = 11 : i64} {
  func.func @_attention_kernel(%arg0: i32, %arg1: i32, %arg2: i32, %arg3: memref<1x8x32xbf16, #tpu.memory_space<vmem>>, %arg4: memref<1x8x32xbf16, #tpu.memory_space<vmem>>, %arg5: memref<1x8x32xbf16, #tpu.memory_space<vmem>>, %arg6: memref<1x32xf32, #tpu.memory_space<vmem>>, %arg7: memref<1x32xf32, #tpu.memory_space<vmem>>, %arg8: memref<1x32x64xbf16, #tpu.memory_space<vmem>>, %arg9: memref<1x1x64xf32, #tpu.memory_space<vmem>>, %arg10: memref<1x32x64xbf16, #tpu.memory_space<vmem>>, %arg11: memref<1x1x64xf32, #tpu.memory_space<vmem>>, %arg12: memref<1x32x64xbf16, #tpu.memory_space<vmem>>, %arg13: memref<1x1x64xf32, #tpu.memory_space<vmem>>, %arg14: memref<1x64x128xbf16, #tpu.memory_space<vmem>>, %arg15: memref<1x128xf32, #tpu.memory_space<vmem>>, %arg16: memref<1x8x128xf32, #tpu.memory_space<vmem>>, %arg17: memref<8x32xbf16, #tpu.memory_space<vmem>>, %arg18: memref<1x4x8x16xbf16, #tpu.memory_space<vmem>>, %arg19: memref<1x4x8x16xbf16, #tpu.memory_space<vmem>>) attributes {dimension_semantics = [#tpu.dimension_semantics<parallel>, #tpu.dimension_semantics<arbitrary>, #tpu.dimension_semantics<arbitrary>], iteration_bounds = array<i64: 2, 1, 1>, scalar_prefetch = 0 : i64, scratch_operands = 3 : i64, tpu.core_type = #tpu.core_type<tc>, window_params = [{transform_indices = @transform_0, window_bounds = array<i64: 1, 8, 32>}, {transform_indices = @transform_1, window_bounds = array<i64: 1, 8, 32>}, {transform_indices = @transform_2, window_bounds = array<i64: 1, 8, 32>}, {pipeline_mode = #tpu.pipeline_mode<synchronous>, transform_indices = @transform_3, window_bounds = array<i64: 1, 32>}, {pipeline_mode = #tpu.pipeline_mode<synchronous>, transform_indices = @transform_4, window_bounds = array<i64: 1, 32>}, {pipeline_mode = #tpu.pipeline_mode<synchronous>, transform_indices = @transform_5, window_bounds = array<i64: 1, 32, 64>}, {pipeline_mode = #tpu.pipeline_mode<synchronous>, transform_indices = @transform_6, window_bounds = array<i64: 1, 1, 64>}, {pipeline_mode = #tpu.pipeline_mode<synchronous>, transform_indices = @transform_7, window_bounds = array<i64: 1, 32, 64>}, {pipeline_mode = #tpu.pipeline_mode<synchronous>, transform_indices = @transform_8, window_bounds = array<i64: 1, 1, 64>}, {pipeline_mode = #tpu.pipeline_mode<synchronous>, transform_indices = @transform_9, window_bounds = array<i64: 1, 32, 64>}, {pipeline_mode = #tpu.pipeline_mode<synchronous>, transform_indices = @transform_10, window_bounds = array<i64: 1, 1, 64>}, {pipeline_mode = #tpu.pipeline_mode<synchronous>, transform_indices = @transform_11, window_bounds = array<i64: 1, 64, 128>}, {pipeline_mode = #tpu.pipeline_mode<synchronous>, transform_indices = @transform_12, window_bounds = array<i64: 1, 128>}, {transform_indices = @transform_13, window_bounds = array<i64: 1, 8, 128>}]} {
    %c0 = arith.constant 0 : index
    %c0_0 = arith.constant 0 : index
    %0 = vector.load %arg6[%c0, %c0_0] : memref<1x32xf32, #tpu.memory_space<vmem>>, vector<1x32xf32>
    %c0_1 = arith.constant 0 : index
    %c0_2 = arith.constant 0 : index
    %1 = vector.load %arg7[%c0_1, %c0_2] : memref<1x32xf32, #tpu.memory_space<vmem>>, vector<1x32xf32>
    %c0_i32 = arith.constant 0 : i32
    %2 = arith.cmpi eq, %arg2, %c0_i32 : i32
    %3 = arith.extui %2 : i1 to i32
    %c0_i32_3 = arith.constant 0 : i32
    %4 = arith.cmpi ne, %3, %c0_i32_3 : i32
    scf.if %4 {
      %c0_57 = arith.constant 0 : index
      %c0_58 = arith.constant 0 : index
      %c0_59 = arith.constant 0 : index
      %113 = vector.load %arg3[%c0_57, %c0_58, %c0_59] : memref<1x8x32xbf16, #tpu.memory_space<vmem>>, vector<1x8x32xbf16>
      %114 = vector.shape_cast %113 : vector<1x8x32xbf16> to vector<8x32xbf16>
      %115 = arith.extf %114 : vector<8x32xbf16> to vector<8x32xf32>
      %cst_60 = arith.constant dense<0.000000e+00> : vector<8xf32>
      %116 = vector.multi_reduction <add>, %115, %cst_60 [1] : vector<8x32xf32> to vector<8xf32>
      %117 = vector.shape_cast %116 : vector<8xf32> to vector<8x1xf32>
      %cst_61 = arith.constant 3.200000e+01 : f32
      %118 = vector.broadcast %cst_61 : f32 to vector<8x1xf32>
      %119 = arith.divf %117, %118 : vector<8x1xf32>
      %120 = vector.broadcast %119 : vector<8x1xf32> to vector<8x32xf32>
      %121 = arith.subf %115, %120 : vector<8x32xf32>
      %122 = arith.mulf %121, %121 : vector<8x32xf32>
      %cst_62 = arith.constant dense<0.000000e+00> : vector<8xf32>
      %123 = vector.multi_reduction <add>, %122, %cst_62 [1] : vector<8x32xf32> to vector<8xf32>
      %124 = vector.shape_cast %123 : vector<8xf32> to vector<8x1xf32>
      %cst_63 = arith.constant 3.200000e+01 : f32
      %125 = vector.broadcast %cst_63 : f32 to vector<8x1xf32>
      %126 = arith.divf %124, %125 : vector<8x1xf32>
      %127 = vector.broadcast %119 : vector<8x1xf32> to vector<8x32xf32>
      %128 = arith.subf %115, %127 : vector<8x32xf32>
      %cst_64 = arith.constant 9.99999974E-6 : f32
      %129 = vector.broadcast %cst_64 : f32 to vector<8x1xf32>
      %130 = arith.addf %126, %129 : vector<8x1xf32>
      %131 = math.rsqrt %130 : vector<8x1xf32>
      %132 = vector.broadcast %131 : vector<8x1xf32> to vector<8x32xf32>
      %133 = arith.mulf %128, %132 : vector<8x32xf32>
      %134 = vector.broadcast %0 : vector<1x32xf32> to vector<8x32xf32>
      %135 = arith.mulf %133, %134 : vector<8x32xf32>
      %136 = vector.broadcast %1 : vector<1x32xf32> to vector<8x32xf32>
      %137 = arith.addf %135, %136 : vector<8x32xf32>
      %138 = arith.truncf %137 : vector<8x32xf32> to vector<8x32xbf16>
      %c0_65 = arith.constant 0 : index
      %c0_66 = arith.constant 0 : index
      %139 = vector.load %arg17[%c0_65, %c0_66] : memref<8x32xbf16, #tpu.memory_space<vmem>>, vector<8x32xbf16>
      tpu.vector_store %arg17[%c0_65, %c0_66], %138 {strides = array<i32>} : memref<8x32xbf16, #tpu.memory_space<vmem>>, vector<8x32xbf16>,
    } else {
    }
    %c0_i32_4 = arith.constant 0 : i32
    %5 = arith.cmpi eq, %arg1, %c0_i32_4 : i32
    %c0_i32_5 = arith.constant 0 : i32
    %6 = arith.cmpi eq, %arg2, %c0_i32_5 : i32
    %7 = arith.andi %5, %6 : i1
    %8 = arith.extui %7 : i1 to i32
    %c0_i32_6 = arith.constant 0 : i32
    %9 = arith.cmpi ne, %8, %c0_i32_6 : i32
    scf.if %9 {
      %c0_57 = arith.constant 0 : index
      %c0_58 = arith.constant 0 : index
      %c0_59 = arith.constant 0 : index
      %113 = vector.load %arg4[%c0_57, %c0_58, %c0_59] : memref<1x8x32xbf16, #tpu.memory_space<vmem>>, vector<1x8x32xbf16>
      %114 = vector.shape_cast %113 : vector<1x8x32xbf16> to vector<8x32xbf16>
      %115 = arith.extf %114 : vector<8x32xbf16> to vector<8x32xf32>
      %cst_60 = arith.constant dense<0.000000e+00> : vector<8xf32>
      %116 = vector.multi_reduction <add>, %115, %cst_60 [1] : vector<8x32xf32> to vector<8xf32>
      %117 = vector.shape_cast %116 : vector<8xf32> to vector<8x1xf32>
      %cst_61 = arith.constant 3.200000e+01 : f32
      %118 = vector.broadcast %cst_61 : f32 to vector<8x1xf32>
      %119 = arith.divf %117, %118 : vector<8x1xf32>
      %120 = vector.broadcast %119 : vector<8x1xf32> to vector<8x32xf32>
      %121 = arith.subf %115, %120 : vector<8x32xf32>
      %122 = arith.mulf %121, %121 : vector<8x32xf32>
      %cst_62 = arith.constant dense<0.000000e+00> : vector<8xf32>
      %123 = vector.multi_reduction <add>, %122, %cst_62 [1] : vector<8x32xf32> to vector<8xf32>
      %124 = vector.shape_cast %123 : vector<8xf32> to vector<8x1xf32>
      %cst_63 = arith.constant 3.200000e+01 : f32
      %125 = vector.broadcast %cst_63 : f32 to vector<8x1xf32>
      %126 = arith.divf %124, %125 : vector<8x1xf32>
      %127 = vector.broadcast %119 : vector<8x1xf32> to vector<8x32xf32>
      %128 = arith.subf %115, %127 : vector<8x32xf32>
      %cst_64 = arith.constant 9.99999974E-6 : f32
      %129 = vector.broadcast %cst_64 : f32 to vector<8x1xf32>
      %130 = arith.addf %126, %129 : vector<8x1xf32>
      %131 = math.rsqrt %130 : vector<8x1xf32>
      %132 = vector.broadcast %131 : vector<8x1xf32> to vector<8x32xf32>
      %133 = arith.mulf %128, %132 : vector<8x32xf32>
      %134 = vector.broadcast %0 : vector<1x32xf32> to vector<8x32xf32>
      %135 = arith.mulf %133, %134 : vector<8x32xf32>
      %136 = vector.broadcast %1 : vector<1x32xf32> to vector<8x32xf32>
      %137 = arith.addf %135, %136 : vector<8x32xf32>
      %138 = arith.truncf %137 : vector<8x32xf32> to vector<8x32xbf16>
      %c0_65 = arith.constant 0 : index
      %c0_66 = arith.constant 0 : index
      %c0_67 = arith.constant 0 : index
      %139 = vector.load %arg5[%c0_65, %c0_66, %c0_67] : memref<1x8x32xbf16, #tpu.memory_space<vmem>>, vector<1x8x32xbf16>
      %140 = vector.shape_cast %139 : vector<1x8x32xbf16> to vector<8x32xbf16>
      %141 = arith.extf %140 : vector<8x32xbf16> to vector<8x32xf32>
      %cst_68 = arith.constant dense<0.000000e+00> : vector<8xf32>
      %142 = vector.multi_reduction <add>, %141, %cst_68 [1] : vector<8x32xf32> to vector<8xf32>
      %143 = vector.shape_cast %142 : vector<8xf32> to vector<8x1xf32>
      %cst_69 = arith.constant 3.200000e+01 : f32
      %144 = vector.broadcast %cst_69 : f32 to vector<8x1xf32>
      %145 = arith.divf %143, %144 : vector<8x1xf32>
      %146 = vector.broadcast %145 : vector<8x1xf32> to vector<8x32xf32>
      %147 = arith.subf %141, %146 : vector<8x32xf32>
      %148 = arith.mulf %147, %147 : vector<8x32xf32>
      %cst_70 = arith.constant dense<0.000000e+00> : vector<8xf32>
      %149 = vector.multi_reduction <add>, %148, %cst_70 [1] : vector<8x32xf32> to vector<8xf32>
      %150 = vector.shape_cast %149 : vector<8xf32> to vector<8x1xf32>
      %cst_71 = arith.constant 3.200000e+01 : f32
      %151 = vector.broadcast %cst_71 : f32 to vector<8x1xf32>
      %152 = arith.divf %150, %151 : vector<8x1xf32>
      %153 = vector.broadcast %145 : vector<8x1xf32> to vector<8x32xf32>
      %154 = arith.subf %141, %153 : vector<8x32xf32>
      %cst_72 = arith.constant 9.99999974E-6 : f32
      %155 = vector.broadcast %cst_72 : f32 to vector<8x1xf32>
      %156 = arith.addf %152, %155 : vector<8x1xf32>
      %157 = math.rsqrt %156 : vector<8x1xf32>
      %158 = vector.broadcast %157 : vector<8x1xf32> to vector<8x32xf32>
      %159 = arith.mulf %154, %158 : vector<8x32xf32>
      %160 = vector.broadcast %0 : vector<1x32xf32> to vector<8x32xf32>
      %161 = arith.mulf %159, %160 : vector<8x32xf32>
      %162 = vector.broadcast %1 : vector<1x32xf32> to vector<8x32xf32>
      %163 = arith.addf %161, %162 : vector<8x32xf32>
      %164 = arith.truncf %163 : vector<8x32xf32> to vector<8x32xbf16>
      %c0_73 = arith.constant 0 : index
      %c0_74 = arith.constant 0 : index
      %c0_75 = arith.constant 0 : index
      %165 = vector.load %arg10[%c0_73, %c0_74, %c0_75] : memref<1x32x64xbf16, #tpu.memory_space<vmem>>, vector<1x32x64xbf16>
      %166 = vector.shape_cast %165 : vector<1x32x64xbf16> to vector<32x64xbf16>
      %cst_76 = arith.constant dense<0.000000e+00> : vector<8x64xf32>
      %167 = tpu.matmul %138, %166, %cst_76 {dimension_numbers = #tpu.dot_dimension_numbers<[1], [0], [0], [1], [0, 0, 1, 1], [], []>} : vector<8x32xbf16>, vector<32x64xbf16>, vector<8x64xf32> -> vector<8x64xf32>
      %c0_77 = arith.constant 0 : index
      %c0_78 = arith.constant 0 : index
      %c0_79 = arith.constant 0 : index
      %168 = vector.load %arg11[%c0_77, %c0_78, %c0_79] : memref<1x1x64xf32, #tpu.memory_space<vmem>>, vector<1x1x64xf32>
      %169 = vector.shape_cast %168 : vector<1x1x64xf32> to vector<1x64xf32>
      %170 = vector.broadcast %169 : vector<1x64xf32> to vector<8x64xf32>
      %171 = arith.addf %167, %170 : vector<8x64xf32>
      %172 = arith.truncf %171 : vector<8x64xf32> to vector<8x64xbf16>
      %c0_80 = arith.constant 0 : index
      %c0_81 = arith.constant 0 : index
      %c0_82 = arith.constant 0 : index
      %173 = vector.load %arg12[%c0_80, %c0_81, %c0_82] : memref<1x32x64xbf16, #tpu.memory_space<vmem>>, vector<1x32x64xbf16>
      %174 = vector.shape_cast %173 : vector<1x32x64xbf16> to vector<32x64xbf16>
      %cst_83 = arith.constant dense<0.000000e+00> : vector<8x64xf32>
      %175 = tpu.matmul %164, %174, %cst_83 {dimension_numbers = #tpu.dot_dimension_numbers<[1], [0], [0], [1], [0, 0, 1, 1], [], []>} : vector<8x32xbf16>, vector<32x64xbf16>, vector<8x64xf32> -> vector<8x64xf32>
      %c0_84 = arith.constant 0 : index
      %c0_85 = arith.constant 0 : index
      %c0_86 = arith.constant 0 : index
      %176 = vector.load %arg13[%c0_84, %c0_85, %c0_86] : memref<1x1x64xf32, #tpu.memory_space<vmem>>, vector<1x1x64xf32>
      %177 = vector.shape_cast %176 : vector<1x1x64xf32> to vector<1x64xf32>
      %178 = vector.broadcast %177 : vector<1x64xf32> to vector<8x64xf32>
      %179 = arith.addf %175, %178 : vector<8x64xf32>
      %180 = arith.truncf %179 : vector<8x64xf32> to vector<8x64xbf16>
      %181 = vector.extract_strided_slice %172 {offsets = [0, 0], sizes = [8, 16], strides = [1, 1]} : vector<8x64xbf16> to vector<8x16xbf16>
      %c0_87 = arith.constant 0 : index
      %c0_88 = arith.constant 0 : index
      %c0_89 = arith.constant 0 : index
      %c0_90 = arith.constant 0 : index
      %182 = vector.load %arg18[%c0_87, %c0_88, %c0_89, %c0_90] : memref<1x4x8x16xbf16, #tpu.memory_space<vmem>>, vector<1x1x8x16xbf16>
      %183 = vector.shape_cast %182 : vector<1x1x8x16xbf16> to vector<8x16xbf16>
      %184 = vector.shape_cast %181 : vector<8x16xbf16> to vector<1x1x8x16xbf16>
      tpu.vector_store %arg18[%c0_87, %c0_88, %c0_89, %c0_90], %184 {strides = array<i32>} : memref<1x4x8x16xbf16, #tpu.memory_space<vmem>>, vector<1x1x8x16xbf16>,
      %185 = vector.extract_strided_slice %180 {offsets = [0, 0], sizes = [8, 16], strides = [1, 1]} : vector<8x64xbf16> to vector<8x16xbf16>
      %c0_91 = arith.constant 0 : index
      %c0_92 = arith.constant 0 : index
      %c0_93 = arith.constant 0 : index
      %c0_94 = arith.constant 0 : index
      %186 = vector.load %arg19[%c0_91, %c0_92, %c0_93, %c0_94] : memref<1x4x8x16xbf16, #tpu.memory_space<vmem>>, vector<1x1x8x16xbf16>
      %187 = vector.shape_cast %186 : vector<1x1x8x16xbf16> to vector<8x16xbf16>
      %188 = vector.shape_cast %185 : vector<8x16xbf16> to vector<1x1x8x16xbf16>
      tpu.vector_store %arg19[%c0_91, %c0_92, %c0_93, %c0_94], %188 {strides = array<i32>} : memref<1x4x8x16xbf16, #tpu.memory_space<vmem>>, vector<1x1x8x16xbf16>,
      %189 = vector.extract_strided_slice %172 {offsets = [0, 16], sizes = [8, 16], strides = [1, 1]} : vector<8x64xbf16> to vector<8x16xbf16>
      %c0_95 = arith.constant 0 : index
      %c1_96 = arith.constant 1 : index
      %c0_97 = arith.constant 0 : index
      %c0_98 = arith.constant 0 : index
      %190 = vector.load %arg18[%c0_95, %c1_96, %c0_97, %c0_98] : memref<1x4x8x16xbf16, #tpu.memory_space<vmem>>, vector<1x1x8x16xbf16>
      %191 = vector.shape_cast %190 : vector<1x1x8x16xbf16> to vector<8x16xbf16>
      %192 = vector.shape_cast %189 : vector<8x16xbf16> to vector<1x1x8x16xbf16>
      tpu.vector_store %arg18[%c0_95, %c1_96, %c0_97, %c0_98], %192 {strides = array<i32>} : memref<1x4x8x16xbf16, #tpu.memory_space<vmem>>, vector<1x1x8x16xbf16>,
      %193 = vector.extract_strided_slice %180 {offsets = [0, 16], sizes = [8, 16], strides = [1, 1]} : vector<8x64xbf16> to vector<8x16xbf16>
      %c0_99 = arith.constant 0 : index
      %c1_100 = arith.constant 1 : index
      %c0_101 = arith.constant 0 : index
      %c0_102 = arith.constant 0 : index
      %194 = vector.load %arg19[%c0_99, %c1_100, %c0_101, %c0_102] : memref<1x4x8x16xbf16, #tpu.memory_space<vmem>>, vector<1x1x8x16xbf16>
      %195 = vector.shape_cast %194 : vector<1x1x8x16xbf16> to vector<8x16xbf16>
      %196 = vector.shape_cast %193 : vector<8x16xbf16> to vector<1x1x8x16xbf16>
      tpu.vector_store %arg19[%c0_99, %c1_100, %c0_101, %c0_102], %196 {strides = array<i32>} : memref<1x4x8x16xbf16, #tpu.memory_space<vmem>>, vector<1x1x8x16xbf16>,
      %197 = vector.extract_strided_slice %172 {offsets = [0, 32], sizes = [8, 16], strides = [1, 1]} : vector<8x64xbf16> to vector<8x16xbf16>
      %c0_103 = arith.constant 0 : index
      %c2_104 = arith.constant 2 : index
      %c0_105 = arith.constant 0 : index
      %c0_106 = arith.constant 0 : index
      %198 = vector.load %arg18[%c0_103, %c2_104, %c0_105, %c0_106] : memref<1x4x8x16xbf16, #tpu.memory_space<vmem>>, vector<1x1x8x16xbf16>
      %199 = vector.shape_cast %198 : vector<1x1x8x16xbf16> to vector<8x16xbf16>
      %200 = vector.shape_cast %197 : vector<8x16xbf16> to vector<1x1x8x16xbf16>
      tpu.vector_store %arg18[%c0_103, %c2_104, %c0_105, %c0_106], %200 {strides = array<i32>} : memref<1x4x8x16xbf16, #tpu.memory_space<vmem>>, vector<1x1x8x16xbf16>,
      %201 = vector.extract_strided_slice %180 {offsets = [0, 32], sizes = [8, 16], strides = [1, 1]} : vector<8x64xbf16> to vector<8x16xbf16>
      %c0_107 = arith.constant 0 : index
      %c2_108 = arith.constant 2 : index
      %c0_109 = arith.constant 0 : index
      %c0_110 = arith.constant 0 : index
      %202 = vector.load %arg19[%c0_107, %c2_108, %c0_109, %c0_110] : memref<1x4x8x16xbf16, #tpu.memory_space<vmem>>, vector<1x1x8x16xbf16>
      %203 = vector.shape_cast %202 : vector<1x1x8x16xbf16> to vector<8x16xbf16>
      %204 = vector.shape_cast %201 : vector<8x16xbf16> to vector<1x1x8x16xbf16>
      tpu.vector_store %arg19[%c0_107, %c2_108, %c0_109, %c0_110], %204 {strides = array<i32>} : memref<1x4x8x16xbf16, #tpu.memory_space<vmem>>, vector<1x1x8x16xbf16>,
      %205 = vector.extract_strided_slice %172 {offsets = [0, 48], sizes = [8, 16], strides = [1, 1]} : vector<8x64xbf16> to vector<8x16xbf16>
      %c0_111 = arith.constant 0 : index
      %c3_112 = arith.constant 3 : index
      %c0_113 = arith.constant 0 : index
      %c0_114 = arith.constant 0 : index
      %206 = vector.load %arg18[%c0_111, %c3_112, %c0_113, %c0_114] : memref<1x4x8x16xbf16, #tpu.memory_space<vmem>>, vector<1x1x8x16xbf16>
      %207 = vector.shape_cast %206 : vector<1x1x8x16xbf16> to vector<8x16xbf16>
      %208 = vector.shape_cast %205 : vector<8x16xbf16> to vector<1x1x8x16xbf16>
      tpu.vector_store %arg18[%c0_111, %c3_112, %c0_113, %c0_114], %208 {strides = array<i32>} : memref<1x4x8x16xbf16, #tpu.memory_space<vmem>>, vector<1x1x8x16xbf16>,
      %209 = vector.extract_strided_slice %180 {offsets = [0, 48], sizes = [8, 16], strides = [1, 1]} : vector<8x64xbf16> to vector<8x16xbf16>
      %c0_115 = arith.constant 0 : index
      %c3_116 = arith.constant 3 : index
      %c0_117 = arith.constant 0 : index
      %c0_118 = arith.constant 0 : index
      %210 = vector.load %arg19[%c0_115, %c3_116, %c0_117, %c0_118] : memref<1x4x8x16xbf16, #tpu.memory_space<vmem>>, vector<1x1x8x16xbf16>
      %211 = vector.shape_cast %210 : vector<1x1x8x16xbf16> to vector<8x16xbf16>
      %212 = vector.shape_cast %209 : vector<8x16xbf16> to vector<1x1x8x16xbf16>
      tpu.vector_store %arg19[%c0_115, %c3_116, %c0_117, %c0_118], %212 {strides = array<i32>} : memref<1x4x8x16xbf16, #tpu.memory_space<vmem>>, vector<1x1x8x16xbf16>,
    } else {
    }
    %c0_7 = arith.constant 0 : index
    %c0_8 = arith.constant 0 : index
    %10 = vector.load %arg17[%c0_7, %c0_8] : memref<8x32xbf16, #tpu.memory_space<vmem>>, vector<8x32xbf16>
    %11 = arith.index_cast %arg2 : i32 to index
    %c0_9 = arith.constant 0 : index
    %c0_10 = arith.constant 0 : index
    %12 = vector.load %arg8[%11, %c0_9, %c0_10] : memref<1x32x64xbf16, #tpu.memory_space<vmem>>, vector<1x32x64xbf16>
    %13 = vector.shape_cast %12 : vector<1x32x64xbf16> to vector<32x64xbf16>
    %cst = arith.constant dense<0.000000e+00> : vector<8x64xf32>
    %14 = tpu.matmul %10, %13, %cst {dimension_numbers = #tpu.dot_dimension_numbers<[1], [0], [0], [1], [0, 0, 1, 1], [], []>} : vector<8x32xbf16>, vector<32x64xbf16>, vector<8x64xf32> -> vector<8x64xf32>
    %15 = arith.index_cast %arg2 : i32 to index
    %c0_11 = arith.constant 0 : index
    %c0_12 = arith.constant 0 : index
    %16 = vector.load %arg9[%15, %c0_11, %c0_12] : memref<1x1x64xf32, #tpu.memory_space<vmem>>, vector<1x1x64xf32>
    %17 = vector.shape_cast %16 : vector<1x1x64xf32> to vector<1x64xf32>
    %18 = vector.broadcast %17 : vector<1x64xf32> to vector<8x64xf32>
    %19 = arith.addf %14, %18 : vector<8x64xf32>
    %20 = arith.truncf %19 : vector<8x64xf32> to vector<8x64xbf16>
    %21 = vector.extract_strided_slice %20 {offsets = [0, 0], sizes = [8, 16], strides = [1, 1]} : vector<8x64xbf16> to vector<8x16xbf16>
    %22 = arith.index_cast %arg2 : i32 to index
    %c0_13 = arith.constant 0 : index
    %c0_14 = arith.constant 0 : index
    %c0_15 = arith.constant 0 : index
    %23 = vector.load %arg18[%22, %c0_13, %c0_14, %c0_15] : memref<1x4x8x16xbf16, #tpu.memory_space<vmem>>, vector<1x1x8x16xbf16>
    %24 = vector.shape_cast %23 : vector<1x1x8x16xbf16> to vector<8x16xbf16>
    %25 = arith.index_cast %arg2 : i32 to index
    %c0_16 = arith.constant 0 : index
    %c0_17 = arith.constant 0 : index
    %c0_18 = arith.constant 0 : index
    %26 = vector.load %arg19[%25, %c0_16, %c0_17, %c0_18] : memref<1x4x8x16xbf16, #tpu.memory_space<vmem>>, vector<1x1x8x16xbf16>
    %27 = vector.shape_cast %26 : vector<1x1x8x16xbf16> to vector<8x16xbf16>
    %cst_19 = arith.constant dense<0.000000e+00> : vector<8x8xf32>
    %28 = tpu.matmul %21, %24, %cst_19 {dimension_numbers = #tpu.dot_dimension_numbers<[1], [1], [0], [0], [0, 0, 1, 0], [], []>} : vector<8x16xbf16>, vector<8x16xbf16>, vector<8x8xf32> -> vector<8x8xf32>
    %cst_20 = arith.constant dense<0xFF800000> : vector<8xf32>
    %29 = vector.multi_reduction <maximumf>, %28, %cst_20 [1] : vector<8x8xf32> to vector<8xf32>
    %30 = vector.shape_cast %29 : vector<8xf32> to vector<8x1xf32>
    %31 = vector.broadcast %30 : vector<8x1xf32> to vector<8x8xf32>
    %32 = arith.subf %28, %31 : vector<8x8xf32>
    %33 = math.exp %32 : vector<8x8xf32>
    %cst_21 = arith.constant dense<0.000000e+00> : vector<8xf32>
    %34 = vector.multi_reduction <add>, %33, %cst_21 [1] : vector<8x8xf32> to vector<8xf32>
    %35 = vector.shape_cast %34 : vector<8xf32> to vector<8x1xf32>
    %36 = arith.truncf %33 : vector<8x8xf32> to vector<8x8xbf16>
    %cst_22 = arith.constant dense<0.000000e+00> : vector<8x16xf32>
    %37 = tpu.matmul %36, %27, %cst_22 {dimension_numbers = #tpu.dot_dimension_numbers<[1], [0], [0], [1], [0, 0, 1, 1], [], []>} : vector<8x8xbf16>, vector<8x16xbf16>, vector<8x16xf32> -> vector<8x16xf32>
    %38 = tpu.reciprocal %35 {approx = true} : vector<8x1xf32> -> vector<8x1xf32>
    %39 = vector.broadcast %38 : vector<8x1xf32> to vector<8x16xf32>
    %40 = arith.mulf %37, %39 : vector<8x16xf32>
    %41 = vector.extract_strided_slice %20 {offsets = [0, 16], sizes = [8, 16], strides = [1, 1]} : vector<8x64xbf16> to vector<8x16xbf16>
    %42 = arith.index_cast %arg2 : i32 to index
    %c1 = arith.constant 1 : index
    %c0_23 = arith.constant 0 : index
    %c0_24 = arith.constant 0 : index
    %43 = vector.load %arg18[%42, %c1, %c0_23, %c0_24] : memref<1x4x8x16xbf16, #tpu.memory_space<vmem>>, vector<1x1x8x16xbf16>
    %44 = vector.shape_cast %43 : vector<1x1x8x16xbf16> to vector<8x16xbf16>
    %45 = arith.index_cast %arg2 : i32 to index
    %c1_25 = arith.constant 1 : index
    %c0_26 = arith.constant 0 : index
    %c0_27 = arith.constant 0 : index
    %46 = vector.load %arg19[%45, %c1_25, %c0_26, %c0_27] : memref<1x4x8x16xbf16, #tpu.memory_space<vmem>>, vector<1x1x8x16xbf16>
    %47 = vector.shape_cast %46 : vector<1x1x8x16xbf16> to vector<8x16xbf16>
    %cst_28 = arith.constant dense<0.000000e+00> : vector<8x8xf32>
    %48 = tpu.matmul %41, %44, %cst_28 {dimension_numbers = #tpu.dot_dimension_numbers<[1], [1], [0], [0], [0, 0, 1, 0], [], []>} : vector<8x16xbf16>, vector<8x16xbf16>, vector<8x8xf32> -> vector<8x8xf32>
    %cst_29 = arith.constant dense<0xFF800000> : vector<8xf32>
    %49 = vector.multi_reduction <maximumf>, %48, %cst_29 [1] : vector<8x8xf32> to vector<8xf32>
    %50 = vector.shape_cast %49 : vector<8xf32> to vector<8x1xf32>
    %51 = vector.broadcast %50 : vector<8x1xf32> to vector<8x8xf32>
    %52 = arith.subf %48, %51 : vector<8x8xf32>
    %53 = math.exp %52 : vector<8x8xf32>
    %cst_30 = arith.constant dense<0.000000e+00> : vector<8xf32>
    %54 = vector.multi_reduction <add>, %53, %cst_30 [1] : vector<8x8xf32> to vector<8xf32>
    %55 = vector.shape_cast %54 : vector<8xf32> to vector<8x1xf32>
    %56 = arith.truncf %53 : vector<8x8xf32> to vector<8x8xbf16>
    %cst_31 = arith.constant dense<0.000000e+00> : vector<8x16xf32>
    %57 = tpu.matmul %56, %47, %cst_31 {dimension_numbers = #tpu.dot_dimension_numbers<[1], [0], [0], [1], [0, 0, 1, 1], [], []>} : vector<8x8xbf16>, vector<8x16xbf16>, vector<8x16xf32> -> vector<8x16xf32>
    %58 = tpu.reciprocal %55 {approx = true} : vector<8x1xf32> -> vector<8x1xf32>
    %59 = vector.broadcast %58 : vector<8x1xf32> to vector<8x16xf32>
    %60 = arith.mulf %57, %59 : vector<8x16xf32>
    %61 = vector.extract_strided_slice %20 {offsets = [0, 32], sizes = [8, 16], strides = [1, 1]} : vector<8x64xbf16> to vector<8x16xbf16>
    %62 = arith.index_cast %arg2 : i32 to index
    %c2 = arith.constant 2 : index
    %c0_32 = arith.constant 0 : index
    %c0_33 = arith.constant 0 : index
    %63 = vector.load %arg18[%62, %c2, %c0_32, %c0_33] : memref<1x4x8x16xbf16, #tpu.memory_space<vmem>>, vector<1x1x8x16xbf16>
    %64 = vector.shape_cast %63 : vector<1x1x8x16xbf16> to vector<8x16xbf16>
    %65 = arith.index_cast %arg2 : i32 to index
    %c2_34 = arith.constant 2 : index
    %c0_35 = arith.constant 0 : index
    %c0_36 = arith.constant 0 : index
    %66 = vector.load %arg19[%65, %c2_34, %c0_35, %c0_36] : memref<1x4x8x16xbf16, #tpu.memory_space<vmem>>, vector<1x1x8x16xbf16>
    %67 = vector.shape_cast %66 : vector<1x1x8x16xbf16> to vector<8x16xbf16>
    %cst_37 = arith.constant dense<0.000000e+00> : vector<8x8xf32>
    %68 = tpu.matmul %61, %64, %cst_37 {dimension_numbers = #tpu.dot_dimension_numbers<[1], [1], [0], [0], [0, 0, 1, 0], [], []>} : vector<8x16xbf16>, vector<8x16xbf16>, vector<8x8xf32> -> vector<8x8xf32>
    %cst_38 = arith.constant dense<0xFF800000> : vector<8xf32>
    %69 = vector.multi_reduction <maximumf>, %68, %cst_38 [1] : vector<8x8xf32> to vector<8xf32>
    %70 = vector.shape_cast %69 : vector<8xf32> to vector<8x1xf32>
    %71 = vector.broadcast %70 : vector<8x1xf32> to vector<8x8xf32>
    %72 = arith.subf %68, %71 : vector<8x8xf32>
    %73 = math.exp %72 : vector<8x8xf32>
    %cst_39 = arith.constant dense<0.000000e+00> : vector<8xf32>
    %74 = vector.multi_reduction <add>, %73, %cst_39 [1] : vector<8x8xf32> to vector<8xf32>
    %75 = vector.shape_cast %74 : vector<8xf32> to vector<8x1xf32>
    %76 = arith.truncf %73 : vector<8x8xf32> to vector<8x8xbf16>
    %cst_40 = arith.constant dense<0.000000e+00> : vector<8x16xf32>
    %77 = tpu.matmul %76, %67, %cst_40 {dimension_numbers = #tpu.dot_dimension_numbers<[1], [0], [0], [1], [0, 0, 1, 1], [], []>} : vector<8x8xbf16>, vector<8x16xbf16>, vector<8x16xf32> -> vector<8x16xf32>
    %78 = tpu.reciprocal %75 {approx = true} : vector<8x1xf32> -> vector<8x1xf32>
    %79 = vector.broadcast %78 : vector<8x1xf32> to vector<8x16xf32>
    %80 = arith.mulf %77, %79 : vector<8x16xf32>
    %81 = vector.extract_strided_slice %20 {offsets = [0, 48], sizes = [8, 16], strides = [1, 1]} : vector<8x64xbf16> to vector<8x16xbf16>
    %82 = arith.index_cast %arg2 : i32 to index
    %c3 = arith.constant 3 : index
    %c0_41 = arith.constant 0 : index
    %c0_42 = arith.constant 0 : index
    %83 = vector.load %arg18[%82, %c3, %c0_41, %c0_42] : memref<1x4x8x16xbf16, #tpu.memory_space<vmem>>, vector<1x1x8x16xbf16>
    %84 = vector.shape_cast %83 : vector<1x1x8x16xbf16> to vector<8x16xbf16>
    %85 = arith.index_cast %arg2 : i32 to index
    %c3_43 = arith.constant 3 : index
    %c0_44 = arith.constant 0 : index
    %c0_45 = arith.constant 0 : index
    %86 = vector.load %arg19[%85, %c3_43, %c0_44, %c0_45] : memref<1x4x8x16xbf16, #tpu.memory_space<vmem>>, vector<1x1x8x16xbf16>
    %87 = vector.shape_cast %86 : vector<1x1x8x16xbf16> to vector<8x16xbf16>
    %cst_46 = arith.constant dense<0.000000e+00> : vector<8x8xf32>
    %88 = tpu.matmul %81, %84, %cst_46 {dimension_numbers = #tpu.dot_dimension_numbers<[1], [1], [0], [0], [0, 0, 1, 0], [], []>} : vector<8x16xbf16>, vector<8x16xbf16>, vector<8x8xf32> -> vector<8x8xf32>
    %cst_47 = arith.constant dense<0xFF800000> : vector<8xf32>
    %89 = vector.multi_reduction <maximumf>, %88, %cst_47 [1] : vector<8x8xf32> to vector<8xf32>
    %90 = vector.shape_cast %89 : vector<8xf32> to vector<8x1xf32>
    %91 = vector.broadcast %90 : vector<8x1xf32> to vector<8x8xf32>
    %92 = arith.subf %88, %91 : vector<8x8xf32>
    %93 = math.exp %92 : vector<8x8xf32>
    %cst_48 = arith.constant dense<0.000000e+00> : vector<8xf32>
    %94 = vector.multi_reduction <add>, %93, %cst_48 [1] : vector<8x8xf32> to vector<8xf32>
    %95 = vector.shape_cast %94 : vector<8xf32> to vector<8x1xf32>
    %96 = arith.truncf %93 : vector<8x8xf32> to vector<8x8xbf16>
    %cst_49 = arith.constant dense<0.000000e+00> : vector<8x16xf32>
    %97 = tpu.matmul %96, %87, %cst_49 {dimension_numbers = #tpu.dot_dimension_numbers<[1], [0], [0], [1], [0, 0, 1, 1], [], []>} : vector<8x8xbf16>, vector<8x16xbf16>, vector<8x16xf32> -> vector<8x16xf32>
    %98 = tpu.reciprocal %95 {approx = true} : vector<8x1xf32> -> vector<8x1xf32>
    %99 = vector.broadcast %98 : vector<8x1xf32> to vector<8x16xf32>
    %100 = arith.mulf %97, %99 : vector<8x16xf32>
    %101 = tpu.concatenate %40, %60, %80, %100 in 1 : vector<8x16xf32>, vector<8x16xf32>, vector<8x16xf32>, vector<8x16xf32> -> vector<8x64xf32>
    %102 = arith.truncf %101 : vector<8x64xf32> to vector<8x64xbf16>
    %103 = arith.index_cast %arg2 : i32 to index
    %c0_50 = arith.constant 0 : index
    %c0_51 = arith.constant 0 : index
    %104 = vector.load %arg14[%103, %c0_50, %c0_51] : memref<1x64x128xbf16, #tpu.memory_space<vmem>>, vector<1x64x128xbf16>
    %105 = vector.shape_cast %104 : vector<1x64x128xbf16> to vector<64x128xbf16>
    %cst_52 = arith.constant dense<0.000000e+00> : vector<8x128xf32>
    %106 = tpu.matmul %102, %105, %cst_52 {dimension_numbers = #tpu.dot_dimension_numbers<[1], [0], [0], [1], [0, 0, 1, 1], [], []>} : vector<8x64xbf16>, vector<64x128xbf16>, vector<8x128xf32> -> vector<8x128xf32>
    %c0_i32_53 = arith.constant 0 : i32
    %107 = arith.cmpi eq, %arg2, %c0_i32_53 : i32
    %108 = arith.extui %107 : i1 to i32
    %c0_i32_54 = arith.constant 0 : i32
    %109 = arith.cmpi ne, %108, %c0_i32_54 : i32
    scf.if %109 {
      %c0_57 = arith.constant 0 : index
      %c0_58 = arith.constant 0 : index
      %113 = vector.load %arg15[%c0_57, %c0_58] : memref<1x128xf32, #tpu.memory_space<vmem>>, vector<1x128xf32>
      %114 = vector.broadcast %113 : vector<1x128xf32> to vector<8x128xf32>
      %115 = arith.addf %106, %114 : vector<8x128xf32>
      %c0_59 = arith.constant 0 : index
      %c0_60 = arith.constant 0 : index
      %c0_61 = arith.constant 0 : index
      %116 = vector.load %arg16[%c0_59, %c0_60, %c0_61] : memref<1x8x128xf32, #tpu.memory_space<vmem>>, vector<1x8x128xf32>
      %117 = vector.shape_cast %116 : vector<1x8x128xf32> to vector<8x128xf32>
      %118 = vector.shape_cast %115 : vector<8x128xf32> to vector<1x8x128xf32>
      tpu.vector_store %arg16[%c0_59, %c0_60, %c0_61], %118 {strides = array<i32>} : memref<1x8x128xf32, #tpu.memory_space<vmem>>, vector<1x8x128xf32>,
    } else {
    }
    %c0_i32_55 = arith.constant 0 : i32
    %110 = arith.cmpi sgt, %arg2, %c0_i32_55 : i32
    %111 = arith.extui %110 : i1 to i32
    %c0_i32_56 = arith.constant 0 : i32
    %112 = arith.cmpi ne, %111, %c0_i32_56 : i32
    scf.if %112 {
      %c0_57 = arith.constant 0 : index
      %c0_58 = arith.constant 0 : index
      %c0_59 = arith.constant 0 : index
      %113 = vector.load %arg16[%c0_57, %c0_58, %c0_59] : memref<1x8x128xf32, #tpu.memory_space<vmem>>, vector<1x8x128xf32>
      %114 = vector.shape_cast %113 : vector<1x8x128xf32> to vector<8x128xf32>
      %115 = arith.addf %114, %106 : vector<8x128xf32>
      %c0_60 = arith.constant 0 : index
      %c0_61 = arith.constant 0 : index
      %c0_62 = arith.constant 0 : index
      %116 = vector.load %arg16[%c0_60, %c0_61, %c0_62] : memref<1x8x128xf32, #tpu.memory_space<vmem>>, vector<1x8x128xf32>
      %117 = vector.shape_cast %116 : vector<1x8x128xf32> to vector<8x128xf32>
      %118 = vector.shape_cast %115 : vector<8x128xf32> to vector<1x8x128xf32>
      tpu.vector_store %arg16[%c0_60, %c0_61, %c0_62], %118 {strides = array<i32>} : memref<1x8x128xf32, #tpu.memory_space<vmem>>, vector<1x8x128xf32>,
    } else {
    }
    return
  }
  func.func @transform_0(%arg0: i32, %arg1: i32, %arg2: i32) -> (i32, i32, i32) {
    %c0_i32 = arith.constant 0 : i32
    %c0_i32_0 = arith.constant 0 : i32
    return %arg0, %arg1, %c0_i32 : i32, i32, i32
  }
  func.func @transform_1(%arg0: i32, %arg1: i32, %arg2: i32) -> (i32, i32, i32) {
    %c0_i32 = arith.constant 0 : i32
    %c0_i32_0 = arith.constant 0 : i32
    %c0_i32_1 = arith.constant 0 : i32
    return %arg0, %c0_i32, %c0_i32_0 : i32, i32, i32
  }
  func.func @transform_2(%arg0: i32, %arg1: i32, %arg2: i32) -> (i32, i32, i32) {
    %c0_i32 = arith.constant 0 : i32
    %c0_i32_0 = arith.constant 0 : i32
    %c0_i32_1 = arith.constant 0 : i32
    return %arg0, %c0_i32, %c0_i32_0 : i32, i32, i32
  }
  func.func @transform_3(%arg0: i32, %arg1: i32, %arg2: i32) -> (i32, i32) {
    %c0_i32 = arith.constant 0 : i32
    %c0_i32_0 = arith.constant 0 : i32
    %c0_i32_1 = arith.constant 0 : i32
    return %c0_i32, %c0_i32_0 : i32, i32
  }
  func.func @transform_4(%arg0: i32, %arg1: i32, %arg2: i32) -> (i32, i32) {
    %c0_i32 = arith.constant 0 : i32
    %c0_i32_0 = arith.constant 0 : i32
    %c0_i32_1 = arith.constant 0 : i32
    return %c0_i32, %c0_i32_0 : i32, i32
  }
  func.func @transform_5(%arg0: i32, %arg1: i32, %arg2: i32) -> (i32, i32, i32) {
    %c0_i32 = arith.constant 0 : i32
    %c0_i32_0 = arith.constant 0 : i32
    %c0_i32_1 = arith.constant 0 : i32
    %c0_i32_2 = arith.constant 0 : i32
    return %c0_i32, %c0_i32_0, %c0_i32_1 : i32, i32, i32
  }
  func.func @transform_6(%arg0: i32, %arg1: i32, %arg2: i32) -> (i32, i32, i32) {
    %c0_i32 = arith.constant 0 : i32
    %c0_i32_0 = arith.constant 0 : i32
    %c0_i32_1 = arith.constant 0 : i32
    %c0_i32_2 = arith.constant 0 : i32
    return %c0_i32, %c0_i32_0, %c0_i32_1 : i32, i32, i32
  }
  func.func @transform_7(%arg0: i32, %arg1: i32, %arg2: i32) -> (i32, i32, i32) {
    %c0_i32 = arith.constant 0 : i32
    %c0_i32_0 = arith.constant 0 : i32
    %c0_i32_1 = arith.constant 0 : i32
    %c0_i32_2 = arith.constant 0 : i32
    return %c0_i32, %c0_i32_0, %c0_i32_1 : i32, i32, i32
  }
  func.func @transform_8(%arg0: i32, %arg1: i32, %arg2: i32) -> (i32, i32, i32) {
    %c0_i32 = arith.constant 0 : i32
    %c0_i32_0 = arith.constant 0 : i32
    %c0_i32_1 = arith.constant 0 : i32
    %c0_i32_2 = arith.constant 0 : i32
    return %c0_i32, %c0_i32_0, %c0_i32_1 : i32, i32, i32
  }
  func.func @transform_9(%arg0: i32, %arg1: i32, %arg2: i32) -> (i32, i32, i32) {
    %c0_i32 = arith.constant 0 : i32
    %c0_i32_0 = arith.constant 0 : i32
    %c0_i32_1 = arith.constant 0 : i32
    %c0_i32_2 = arith.constant 0 : i32
    return %c0_i32, %c0_i32_0, %c0_i32_1 : i32, i32, i32
  }
  func.func @transform_10(%arg0: i32, %arg1: i32, %arg2: i32) -> (i32, i32, i32) {
    %c0_i32 = arith.constant 0 : i32
    %c0_i32_0 = arith.constant 0 : i32
    %c0_i32_1 = arith.constant 0 : i32
    %c0_i32_2 = arith.constant 0 : i32
    return %c0_i32, %c0_i32_0, %c0_i32_1 : i32, i32, i32
  }
  func.func @transform_11(%arg0: i32, %arg1: i32, %arg2: i32) -> (i32, i32, i32) {
    %c0_i32 = arith.constant 0 : i32
    %c0_i32_0 = arith.constant 0 : i32
    %c0_i32_1 = arith.constant 0 : i32
    %c0_i32_2 = arith.constant 0 : i32
    return %c0_i32, %c0_i32_0, %c0_i32_1 : i32, i32, i32
  }
  func.func @transform_12(%arg0: i32, %arg1: i32, %arg2: i32) -> (i32, i32) {
    %c0_i32 = arith.constant 0 : i32
    %c0_i32_0 = arith.constant 0 : i32
    %c0_i32_1 = arith.constant 0 : i32
    return %c0_i32, %c0_i32_0 : i32, i32
  }
  func.func @transform_13(%arg0: i32, %arg1: i32, %arg2: i32) -> (i32, i32, i32) {
    %c0_i32 = arith.constant 0 : i32
    %c0_i32_0 = arith.constant 0 : i32
    return %arg0, %arg1, %c0_i32 : i32, i32, i32
  }
}

</mosaic_0001>

<bundles_post_ra>
// kernel: tpu_custom_call.1
= control target key start
LH: loop header
LB: loop body
LE: loop exit
PB: predicated region body
PF: predicated region fallthrough
CT: control target
= control target key end

     0   :  { %s3030_s0 = inlined_call_operand.hbm [shape: bf16[2,8,32], index: 0, kind: input, shape index: {}]   ;;  %s3031_s1 = inlined_call_operand.hbm [shape: bf16[2,8,32], index: 1, kind: input, shape index: {}]   ;;  %s3032_s2 = inlined_call_operand.hbm [shape: bf16[2,8,32], index: 2, kind: input, shape index: {}]   ;;  %s3033_s3 = inlined_call_operand.hbm [shape: f32[1,32], index: 3, kind: input, shape index: {}]   ;;  %s3034_s4 = inlined_call_operand.hbm [shape: f32[1,32], index: 4, kind: input, shape index: {}]   ;;  %s3035_s5 = inlined_call_operand.hbm [shape: bf16[1,32,64], index: 5, kind: input, shape index: {}]   ;;  %s3036_s6 = inlined_call_operand.hbm [shape: f32[1,1,64], index: 6, kind: input, shape index: {}]   ;;  %s3037_s7 = inlined_call_operand.hbm [shape: bf16[1,32,64], index: 7, kind: input, shape index: {}]   ;;  %s3038_s8 = inlined_call_operand.hbm [shape: f32[1,1,64], index: 8, kind: input, shape index: {}]   ;;  %s3039_s9 = inlined_call_operand.vmem [shape: bf16[1,32,64], index: 9, kind: input, shape index: {}]   ;;  %s3040_s10 = inlined_call_operand.vmem [shape: f32[1,1,64], index: 10, kind: input, shape index: {}]   ;;  %s3041_s11 = inlined_call_operand.hbm [shape: bf16[1,64,128], index: 11, kind: input, shape index: {}]   ;;  %s3042_s12 = inlined_call_operand.vmem [shape: f32[1,128], index: 12, kind: input, shape index: {}]   ;;  %s3043_s13 = inlined_call_operand.hbm [shape: f32[2,8,128], index: 13, kind: output, shape index: {}]  }
   0x1   :  { %3063 = sst [smem:[#allocation38_spill]] %s3031_s1 }
   0x2   :  { %3064 = sst [smem:[#allocation39_spill]] %s3033_s3 }
   0x3   :  { %3065 = sst [smem:[#allocation40_spill]] %s3035_s5 }
   0x4   :  { %3066 = sst [smem:[#allocation41_spill]] %s3037_s7 }
   0x5   :  { %3067 = sst [smem:[#allocation42_spill]] %s3042_s12 }
   0x6   :  { %3068 = sst [smem:[#allocation43_spill]] %s3043_s13 }
   0x7   :  { %18 = vsyncpa [#allocation6], 0 }
   0x8   :  { %20 = vsyncpa [#allocation6 + $0x1], 0 }
   0x9   :  { %21 = vsyncpa [#allocation9], 0 }
   0xa   :  { %23 = vsyncpa [#allocation9 + $0x1], 0 }
   0xb   :  { %24 = vsyncpa [#allocation12], 0 }
   0xc   :  { %25 = vsyncpa [#allocation15], 0 }
   0xd   :  { %26 = vsyncpa [#allocation18], 0 }
   0xe   :  { %27 = vsyncpa [#allocation21], 0 }
   0xf   :  { %28 = vsyncpa [#allocation7], 0 }
  0x10   :  { %30 = vsyncpa [#allocation7 + $0x1], 0  ;;  %s2625_s25 = smov 0   ;;  %s2627_s26 = smov 0  }
  0x11   :  { %s2629_s27 = smov 0   ;;  %s2631_s28 = smov 0  }
  0x12   :  { %s2633_s29 = smov 0   ;;  %s2635_s30 = smov 0  }
  0x13 LB: > { %3069 = sst [smem:[#allocation30_spill]] %s2512_s25  ;;  %s2656_s14 = sadd.s32 4294967295, %s2532_s30   ;;  %s2532_s30 = sphi %s2635_s30, %s36_s30   ;;  %s2528_s29 = sphi %s2633_s29, %s3117_s29   ;;  %s2524_s28 = sphi %s2631_s28, %s3116_s28   ;;  %s2520_s27 = sphi %s2629_s27, %s3120_s27   ;;  %s2516_s26 = sphi %s2627_s26, %s3119_s26   ;;  %s2512_s25 = sphi %s2625_s25, %s3118_s25  }
  0x14   : > { %3070 = sst [smem:[#allocation31_spill]] %s2524_s28  ;;  %p1798_p0 = scmp.ge.s32.totalorder %s2532_s30, 1 }
  0x15   : > { %3071 = sst [smem:[#allocation32_spill]] %s2528_s29  ;;  %p3056_p1 = scmp.eq.s32.totalorder %s2656_s14, 0 }
  0x16   : > { %3072 = sst [smem:[#allocation33_spill]] %s2532_s30  ;;  %p378_p2 = scmp.lt.s32.totalorder %s2532_s30, 3 }
  0x17   : > { %s2534_s16 = smov [#allocation11]   ;;  %s2535_s18 = smov [#allocation14]  }
  0x18   : > { %p2661_p3 = pnand %p1798_p0, %p378_p2  ;;  %s391_s17 = sshll.u32 %s2534_s16, 4  ;;  %s392_s17 = int_to_ptr.vmem [resolvable:$true] %s391_s17 }
  0x19   : > { %s412_s19 = sshll.u32 %s2535_s18, 4  ;;  %s2536_s21 = smov [#allocation17]   ;;  %s2674_s19 = int_to_ptr.vmem [resolvable:$true] %s412_s19 }
  0x1a   : > { %s3073_s15 = scalar_select %p2661_p3, 1, 0 }
  0x1b   : > { %p2017_p5 = pneg %p2661_p3  ;;  %s436_s22 = sshll.u32 %s2536_s21, 4  ;;  %s437_s22 = int_to_ptr.vmem [resolvable:$true] %s436_s22 }
  0x1c   : > { %s2177_s24 = scalar_lea.vmem %s392_s17, 16  ;;  %s2184_s16 = scalar_lea.vmem %s392_s17, 32 }
  0x1d   : > { %p2670_p6 = pnand %p2017_p5, %p3056_p1  ;;  %p2178_p8 = scmp.ne.s32.totalorder %s392_s17, %s2177_s24 }
  0x1e   : > { %p2185_p11 = scmp.lt.s32.totalorder %s392_s17, %s392_s17  ;;  %p2186_p12 = scmp.lt.s32.totalorder %s2184_s16, %s2177_s24 }
  0x1f   : > { %s3074_s20 = scalar_select %p2670_p6, 1, 0 }
  0x20   : > { %p2678_p7 = pneg %p2670_p6  ;;  %p2187_p13 = por %p2186_p12, %p2185_p11 }
  0x22   : > { %p2180_p9 = pnand %p2178_p8, %p2678_p7 }
  0x24   : > { %p2181_p10 = pneg %p2180_p9 }
  0x26   : > { %p2188_p0 = pnand %p2187_p13, %p2181_p10 }
  0x28   : > { %2191 = shalt.err (!%p2188_p0)
}
  0x29   : > { %s3076_s3 = sld [smem:[#allocation39_spill]]  ;;  %s2203_s13 = scalar_lea.vmem %s2674_s19, 256 }
  0x2a   : > { %p2204_p2 = scmp.ne.s32.totalorder %s2674_s19, %s2203_s13  ;;  %p2211_p9 = scmp.lt.s32.totalorder %s2674_s19, %s2674_s19 }
  0x2b   : > { %p2212_p11 = scmp.lt.s32.totalorder %s2203_s13, %s2203_s13 }
  0x2c   : > { %p2206_p5 = pnand %p2204_p2, %p2678_p7 }
  0x2d   : > { %p2213_p10 = por %p2212_p11, %p2211_p9 }
  0x2e   : > { %p2207_p8 = pneg %p2206_p5 }
  0x2f   : > { %2020 = dma.hbm_to_vmem [thread:$0]  (!%p2670_p6), %s3076_s3, 16, %s392_s17, [#allocation12]  }
  0x30   : > { %p2214_p12 = pnand %p2213_p10, %p2207_p8 }
  0x32   : > { %2217 = shalt.err (!%p2214_p12)
}
  0x33   : > { %s3045_s24 = smov 64   ;;  %s3046_s16 = smov 4  }
  0x34   : > { %s3077_s5 = sld [smem:[#allocation40_spill]]  ;;  %s2229_s21 = scalar_lea.vmem %s437_s22, 256 }
  0x35   : > { %p2230_p13 = scmp.ne.s32.totalorder %s437_s22, %s2229_s21  ;;  %p2237_p5 = scmp.lt.s32.totalorder %s437_s22, %s437_s22 }
  0x36   : > { %p2238_p8 = scmp.lt.s32.totalorder %s2229_s21, %s2229_s21 }
  0x37   : > { %p2232_p0 = pnand %p2230_p13, %p2678_p7 }
  0x38   : > { %p2239_p9 = por %p2238_p8, %p2237_p5 }
  0x39   : > { %p2233_p2 = pneg %p2232_p0 }
  0x3a   : > { %2026 = dma.hbm_to_vmem [thread:$0]  (!%p2670_p6), %s3077_s5, 256, %s2674_s19, [#allocation15], %s3045_s24, %s3045_s24, %s3046_s16  }
  0x3b   : > { %p2240_p11 = pnand %p2239_p9, %p2233_p2 }
  0x3d   : > { %2243 = shalt.err (!%p2240_p11)
}
  0x3e   : > { %s3078_s7 = sld [smem:[#allocation41_spill]]  ;;  %s1797_s19 = sadd.s32 4294967294, %s2532_s30  }
  0x3f   : > { %s55_s17 = sadd.s32 1, %s2528_s29  ;;  %s64_s18 = sadd.s32 1, %s2520_s27 }
  0x40   : > { %p57_p10 = scmp.ge.s32.totalorder %s55_s17, 2  ;;  %p71_p12 = scmp.ne.s32.totalorder %s2520_s27, %s2516_s26 }
  0x41   : > { %p72_p13 = scmp.eq.s32.totalorder %s2532_s30, 0  ;;  %p77_p0 = scmp.ne.s32.totalorder %s2516_s26, %s2512_s25 }
  0x42   : > { %s3122_s17 = smov (%p57_p10, %s55_s17), 0  ;;  %p365_p8 = scmp.eq.s32.totalorder %s2656_s14, 1 }
  0x43   : > { %3079 = sst [smem:[#allocation34_spill]] %s3122_s17  ;;  %p2724_p2 = por %p72_p13, %p71_p12 }
  0x44   : > { %2032 = dma.hbm_to_vmem [thread:$0]  (!%p2670_p6), %s3078_s7, 256, %s437_s22, [#allocation18], %s3045_s24, %s3045_s24, %s3046_s16  }
  0x45   : > { %p2730_p5 = por %p3056_p1, %p77_p0  ;;  %s59_s21 = ssub.s32 %s2528_s29, %s3122_s17 }
  0x46   : > { %p62_p9 = scmp.eq.s32.totalorder %s59_s21, 0  ;;  %p371_p11 = scmp.eq.s32.totalorder %s1797_s19, 1 }
  0x47   : > { %s3081_s22 = scalar_select %p2730_p5, 1, 0 }
  0x48   : > { %p2737_p4 = por %p365_p8, %p71_p12  ;;  %p2060_p10 = scmp.lt.s32.totalorder %s2532_s30, 2 }
  0x49   : > { %s2743_s24 = scalar_select %p62_p9, %s2520_s27, %s64_s18  }
  0x4a   : > { %s3082_s13 = scalar_select %p2737_p4, 1, 0 }
  0x4b   : > { %3084 = sst [smem:[#allocation36_spill]] %s2743_s24  ;;  %p2745_p13 = por %p371_p11, %p77_p0 }
  0x4c   : > { %3083 = sst [smem:[#allocation35_spill]] %s3082_s13  ;;  %s3050_s5 = sand.u32 1, %s2520_s27  }
  0x4d   : > { %s3085_s16 = scalar_select %p2745_p13, 1, 0 }
  0x4e   : > { %s2752_s7 = sshll.u32 %s3050_s5, 2  ;;  %s2755_s17 = sshll.u32 %s2528_s29, 6 }
  0x4f   : > { %3086 = sst [smem:[#allocation37_spill]] %s3085_s16  ;;  %p2759_p12 = pnand %p2060_p10, %p2724_p2 }
  0x50   : > { %s502_s18 = sand.u32 1, %s2532_s30   ;;  %s3088_s1 = sld [smem:[#allocation38_spill]] }
  0x51   : > { %s506_s25 = scalar_lea.vmem [#allocation8], %s2752_s7  ;;  %s2539_s5 = smov [#allocation13]  }
  0x52   : > { %s513_s12 = sshll.u32 %s506_s25, 4  ;;  %s402_s13 = sshll.u32 %s2539_s5, 4  ;;  %s514_s12 = int_to_ptr.vmem [resolvable:$true] %s513_s12  ;;  %s403_s13 = int_to_ptr.vmem [resolvable:$true] %s402_s13 }
  0x53   : > { %s2769_s29 = scalar_lea.sflag [#allocation9], %s502_s18  ;;  %p3058_p0 = pneg %p2759_p12 }
  0x54   : > { %s2257_s3 = scalar_lea.vmem %s514_s12, 64  ;;  %s2540_s30 = smov [#allocation8]  }
  0x55   : > { %p2258_p2 = scmp.ne.s32.totalorder %s514_s12, %s2257_s3  ;;  %s2262_s28 = sshll.u32 %s2540_s30, 4  ;;  %s2263_s28 = int_to_ptr.vmem [resolvable:$false] %s2262_s28 }
  0x56   : > { %s511_s16 = scalar_lea.hbm %s3088_s1, %s2755_s17  ;;  %s2264_s24 = scalar_lea.vmem %s2263_s28, 128 }
  0x57   : > { %p2260_p8 = pnand %p2258_p2, %p3058_p0  ;;  %p2265_p11 = scmp.lt.s32.totalorder %s514_s12, %s2263_s28 }
  0x58   : > { %p2266_p10 = scmp.lt.s32.totalorder %s2264_s24, %s2257_s3 }
  0x59   : > { %p2261_p9 = pneg %p2260_p8 }
  0x5a   : > { %p2267_p1 = por %p2266_p10, %p2265_p11 }
  0x5c   : > { %p2268_p13 = pnand %p2267_p1, %p2261_p9 }
  0x5e   : > { %2271 = shalt.err (!%p2268_p13)
}
  0x5f   : > { %2045 = dma.hbm_to_vmem [thread:$0]  (!%p2759_p12), %s511_s16, 64, %s514_s12, %s2769_s29  }
  0x60   : > { %s2283_s5 = scalar_lea.vmem %s403_s13, 16  ;;  %s2290_s25 = scalar_lea.vmem %s403_s13, 32 }
  0x61   : > { %p2284_p4 = scmp.ne.s32.totalorder %s403_s13, %s2283_s5  ;;  %p2291_p0 = scmp.lt.s32.totalorder %s403_s13, %s403_s13 }
  0x62   : > { %p2292_p5 = scmp.lt.s32.totalorder %s2290_s25, %s2283_s5 }
  0x63   : > { %p2286_p2 = pnand %p2284_p4, %p2678_p7 }
  0x64   : > { %p2293_p3 = por %p2292_p5, %p2291_p0 }
  0x65   : > { %p2287_p8 = pneg %p2286_p2 }
  0x67   : > { %p2294_p6 = pnand %p2293_p3, %p2287_p8 }
  0x69   : > { %2297 = shalt.err (!%p2294_p6)
}
  0x6a   : > { %p3089_p1 = scmp.ne.s32.totalorder %s3074_s20, 0  ;;  %s2541_s12 = smov [#allocation16]  }
  0x6b   : > { %s426_s16 = sshll.u32 %s2541_s12, 4  ;;  %s2542_s18 = smov [#allocation19]   ;;  %s427_s16 = int_to_ptr.vmem [resolvable:$true] %s426_s16 }
  0x6c   : > { %2023 = dma.hbm_to_vmem [thread:$0]  (!%p3089_p1), %s3034_s4, 16, %s403_s13, [#allocation12]  }
  0x6d   : > { %s450_s21 = sshll.u32 %s2542_s18, 4  ;;  %s2309_s3 = scalar_lea.vmem %s427_s16, 16  ;;  %s451_s21 = int_to_ptr.vmem [resolvable:$true] %s450_s21 }
  0x6e   : > { %p2310_p4 = scmp.ne.s32.totalorder %s427_s16, %s2309_s3  ;;  %s2316_s24 = scalar_lea.vmem %s427_s16, 32 }
  0x6f   : > { %p2317_p3 = scmp.lt.s32.totalorder %s427_s16, %s427_s16  ;;  %p2318_p6 = scmp.lt.s32.totalorder %s2316_s24, %s2309_s3 }
  0x70   : > { %p2312_p13 = pnand %p2310_p4, %p2678_p7 }
  0x71   : > { %p2319_p5 = por %p2318_p6, %p2317_p3 }
  0x72   : > { %p2313_p9 = pneg %p2312_p13 }
  0x74   : > { %p2320_p0 = pnand %p2319_p5, %p2313_p9 }
  0x76   : > { %2323 = shalt.err (!%p2320_p0)
}
  0x77   : > { %2029 = dma.hbm_to_vmem [thread:$0]  (!%p3089_p1), %s3036_s6, 16, %s427_s16, [#allocation15]  }
  0x78   : > { %s2335_s25 = scalar_lea.vmem %s451_s21, 16  ;;  %s2342_s28 = scalar_lea.vmem %s451_s21, 32 }
  0x79   : > { %p2336_p11 = scmp.ne.s32.totalorder %s451_s21, %s2335_s25  ;;  %p2343_p8 = scmp.lt.s32.totalorder %s451_s21, %s451_s21 }
  0x7a   : > { %p2344_p4 = scmp.lt.s32.totalorder %s2342_s28, %s2335_s25 }
  0x7b   : > { %p2338_p10 = pnand %p2336_p11, %p2678_p7 }
  0x7c   : > { %p2345_p13 = por %p2344_p4, %p2343_p8 }
  0x7d   : > { %p2339_p2 = pneg %p2338_p10 }
  0x7f   : > { %p2346_p3 = pnand %p2345_p13, %p2339_p2 }
  0x81   : > { %2349 = shalt.err (!%p2346_p3)
}
  0x82   : > { %2035 = dma.hbm_to_vmem [thread:$0]  (!%p3089_p1), %s3038_s8, 16, %s451_s21, [#allocation18]  }
  0x83   : > { %s2543_s16 = smov [#allocation20]  }
  0x84   : > { %s466_s18 = sshll.u32 %s2543_s16, 4  ;;  %s467_s18 = int_to_ptr.vmem [resolvable:$true] %s466_s18 }
  0x85   : > { %s2361_s3 = scalar_lea.vmem %s467_s18, 512  ;;  %p2369_p0 = scmp.lt.s32.totalorder %s467_s18, %s467_s18 }
  0x86   : > { %p2362_p9 = scmp.ne.s32.totalorder %s467_s18, %s2361_s3  ;;  %p2370_p11 = scmp.lt.s32.totalorder %s2361_s3, %s2361_s3 }
  0x88   : > { %p2364_p6 = pnand %p2362_p9, %p2678_p7  ;;  %p2371_p10 = por %p2370_p11, %p2369_p0 }
  0x8a   : > { %p2365_p5 = pneg %p2364_p6 }
  0x8c   : > { %p2372_p2 = pnand %p2371_p10, %p2365_p5 }
  0x8e   : > { %2375 = shalt.err (!%p2372_p2)
}
  0x8f   : > { %s3090_s24 = smov 4   ;;  %s3091_s5 = smov 64  }
  0x90   : > { %2038 = dma.hbm_to_vmem [thread:$0]  (!%p3089_p1), %s3041_s11, 512, %s467_s18, [#allocation21], %s3091_s5, %s3091_s5, %s3090_s24  }
  0x91   : > { %s493_s28 = scalar_lea.hbm %s3030_s0, %s2755_s17  ;;  %s487_s30 = scalar_lea.vmem [#allocation5], %s2752_s7 }
  0x92   : > { %s495_s12 = sshll.u32 %s487_s30, 4  ;;  %s3092_s16 = sand.u32 1, %s2520_s27   ;;  %s496_s12 = int_to_ptr.vmem [resolvable:$true] %s495_s12 }
  0x93   : > { %s484_s20 = scalar_lea.sflag [#allocation6], %s3092_s16  ;;  %s2389_s3 = scalar_lea.vmem %s496_s12, 64 }
  0x94   : > { %p2390_p7 = scmp.ne.s32.totalorder %s496_s12, %s2389_s3  ;;  %p3093_p8 = pneg %p2759_p12 }
  0x95   : > { %s2544_s13 = smov [#allocation5]  }
  0x96   : > { %p2392_p4 = pnand %p2390_p7, %p3093_p8  ;;  %s2394_s21 = sshll.u32 %s2544_s13, 4  ;;  %s2395_s21 = int_to_ptr.vmem [resolvable:$false] %s2394_s21 }
  0x97   : > { %s2396_s1 = scalar_lea.vmem %s2395_s21, 128  ;;  %p2397_p1 = scmp.lt.s32.totalorder %s496_s12, %s2395_s21 }
  0x98   : > { %p2393_p13 = pneg %p2392_p4  ;;  %p2398_p3 = scmp.lt.s32.totalorder %s2396_s1, %s2389_s3 }
  0x9a   : > { %p2399_p9 = por %p2398_p3, %p2397_p1 }
  0x9c   : > { %p2400_p6 = pnand %p2399_p9, %p2393_p13 }
  0x9e   : > { %2403 = shalt.err (!%p2400_p6)
}
  0x9f   : > { %2042 = dma.hbm_to_vmem [thread:$0]  (!%p2759_p12), %s493_s28, 64, %s496_s12, %s484_s20  }
  0xa0   : > { %s529_s5 = scalar_lea.hbm %s3032_s2, %s2755_s17  ;;  %s524_s23 = scalar_lea.vmem [#allocation10], %s2752_s7 }
  0xa1   : > { %s531_s25 = sshll.u32 %s524_s23, 4  ;;  %p3094_p0 = pmov %p3093_p8  ;;  %s532_s25 = int_to_ptr.vmem [resolvable:$true] %s531_s25 }
  0xa2   : > { %s2417_s30 = scalar_lea.vmem %s532_s25, 64  ;;  %s2545_s1 = smov [#allocation10]  }
  0xa3   : > { %p2418_p5 = scmp.ne.s32.totalorder %s532_s25, %s2417_s30  ;;  %s2422_s16 = sshll.u32 %s2545_s1, 4  ;;  %s2423_s16 = int_to_ptr.vmem [resolvable:$false] %s2422_s16 }
  0xa4   : > { %s2424_s3 = scalar_lea.vmem %s2423_s16, 128  ;;  %p2425_p2 = scmp.lt.s32.totalorder %s532_s25, %s2423_s16 }
  0xa5   : > { %p2420_p11 = pnand %p2418_p5, %p3094_p0  ;;  %p2426_p7 = scmp.lt.s32.totalorder %s2424_s3, %s2417_s30 }
  0xa7   : > { %p2421_p10 = pneg %p2420_p11  ;;  %p2427_p8 = por %p2426_p7, %p2425_p2 }
  0xa9   : > { %p2428_p4 = pnand %p2427_p8, %p2421_p10 }
  0xab   : > { %2431 = shalt.err (!%p2428_p4)
}
  0xac   : > { %2048 = dma.hbm_to_vmem [thread:$0]  (!%p2759_p12), %s529_s5, 64, %s532_s25, %s2769_s29  }
  0xad   : > { %p3095_p13 = scmp.ne.s32.totalorder %s3073_s15, 0 }
  0xae   : > { %s2836_s7 = sand.u32 (!%p3095_p13), 1, %s2516_s26   ;;  %p3096_p1 = scmp.ne.s32.totalorder (!%p3095_p13), %s3081_s22, 0 }
  0xaf   : > { %540 = sbr.rel (%p3095_p13) target bundleno = 1740 (0x6cc), region = 72  ;;  %s1814_s17 = sshll.u32 (!%p3095_p13), %s2836_s7, 2 }
  0xb0   : > { %s543_s28 = scalar_lea.sflag (!%p3095_p13), [#allocation6], %s2836_s7  ;;  %s546_s12 = scalar_lea.vmem (!%p3095_p13), [#allocation5], %s1814_s17 }
  0xb4   : > { %2483 = dma.done.wait (%p3096_p1), %s543_s28, 64  }
  0xb5   : > { %2485 = vsyncadd (%p3096_p1), %s543_s28, 4294967232  ;;  %s551_s29 = sand.u32 1, %s2656_s14   ;;  %s555_s15 = scalar_lea.vmem [#allocation8], %s1814_s17 }
  0xb6   : > { %s552_s19 = scalar_lea.sflag [#allocation9], %s551_s29 }
  0xb7   : > { %2487 = dma.done.wait (%p3096_p1), %s552_s19, 128  }
  0xb8   : > { %2489 = vsyncadd (%p3096_p1), %s552_s19, 4294967168  ;;  %s564_s20 = scalar_lea.vmem [#allocation10], %s1814_s17  ;;  %p3097_p12 = scmp.eq.s32.totalorder %s2656_s14, 0 }
  0xba   : > { %2491 = dma.done.wait (%p3097_p12), [#allocation12], 32   ;;  %p3098_p3 = pmov %p3097_p12 }
  0xbc   : > { %2493 = vsyncadd (%p3098_p3), [#allocation12], 4294967264  ;;  %p3099_p9 = pmov %p3098_p3 }
  0xbd   : > { %p3100_p6 = pmov %p3098_p3 }
  0xbe   : > { %2495 = dma.done.wait (%p3099_p9), [#allocation15], 272  }
  0xbf   : > { %2497 = vsyncadd (%p3100_p6), [#allocation15], 4294967024  ;;  %p3101_p5 = pmov %p3098_p3 }
  0xc0   : > { %p3102_p0 = pmov %p3098_p3 }
  0xc1   : > { %2499 = dma.done.wait (%p3101_p5), [#allocation18], 272  }
  0xc2   : > { %2501 = vsyncadd (%p3102_p0), [#allocation18], 4294967024  ;;  %p3103_p11 = pmov %p3102_p0 }
  0xc3   : > { %p3104_p10 = pmov %p3102_p0 }
  0xc4   : > { %2503 = dma.done.wait (%p3103_p11), [#allocation21], 512  }
  0xc5   : > { %2505 = vsyncadd (%p3104_p10), [#allocation21], 4294966784  ;;  %vm654_vm0 = vcmask 261120   ;;  %v691_v0 = vld [vmem:[%s555_s15] sm:$0xf]  ;;  %v2134_v24 = vld [vmem:[#allocation17 + $0x8] sm:$0xff]  }
  0xc6   : > { %v652_v1 = vld [vmem:[%s546_s12] sm:$0xf]  ;;  %v692_v2 = vunpack.c.l.bf16 %v691_v0  ;;  %v723_v6 = vld [vmem:[%s564_s20] sm:$0xf]  ;;  %v2546_v25 = vmov 0.0   ;;  %vm2547_vm1 = vmmov 0  }
  0xc7   : > { %v653_v3 = vunpack.c.l.bf16 %v652_v1  ;;  %v724_v7 = vunpack.c.l.bf16 %v723_v6  ;;  %1897 = vmatprep.subr.bf16.mxu0 %v2546_v25  ;;  %1905 = vmatprep.subr.bf16.mxu1 %v2546_v25  ;;  %v2135_v26 = vld [vmem:[#allocation17] sm:$0xff]   ;;  %v1865_v36 = vld [vmem:[#allocation11] ss:$0 sm:$0xff]  ;;  %v1866_v39 = vld [vmem:[#allocation13] ss:$0 sm:$0xff]  ;;  %vm684_vm2 = vcmask 257024  }
  0xc8   : > { %v694_v4 = vsel %vm654_vm0, %v692_v2, 0.0  ;;  %1898 = vmatpush3.bf16.msra.mxu0 %v2134_v24  ;;  %1901 = vmatprep.mubr.msk.bf16.mxu0 %vm2547_vm1, %v2546_v25  ;;  %v2138_v27 = vld [vmem:[%s3039_s9 + $0x8] sm:$0xff]   ;;  %v2139_v28 = vld [vmem:[%s3039_s9] sm:$0xff]   ;;  %v2136_v46 = vld [vmem:[#allocation14 + $0x8] sm:$0xff]   ;;  %vm875_vm3 = vcmask 125952   ;;  %s2548_s18 = smov 96  }
  0xc9   : > { %v655_v5 = vsel %vm654_vm0, %v653_v3, 0.0  ;;  %695 = vadd.xlane.f32.xlu0 %v694_v4  ;;  %v725_v8 = vsel %vm654_vm0, %v724_v7, 0.0  ;;  %1899 = vmatprep.subr.bf16.mxu0 %v2546_v25  ;;  %v2137_v50 = vld [vmem:[#allocation14] sm:$0xff]   ;;  %s2549_s24 = smov 112   ;;  %s2550_s5 = smov 80   ;;  %vm993_vm4 = vcmask 130048  }
  0xca   : > { %1909 = vmatprep.mubr.msk.bf16.mxu1 %vm2547_vm1, %v2546_v25  ;;  %1906 = vmatpush3.bf16.msra.mxu1 %v2138_v27  ;;  %v1825_v58 = vld [vmem:[#allocation19] ss:$0 sm:$0xff]  ;;  %v1835_v1 = vld [vmem:[#allocation16] ss:$0 sm:$0xff]  ;;  %vm1054_vm5 = vcmask 1043456   ;;  %vm1040_vm6 = vcmask 64512  }
  0xcb   : > { %1907 = vmatprep.subr.bf16.mxu1 %v2546_v25  ;;  %s2551_s30 = smov 16   ;;  %s2552_s1 = smov 32   ;;  %vm1454_vm7 = vcmask 392192   ;;  %vm1492_vm8 = vcmask 523264  }
  0xcc   : > { %1900 = vmatpush3.bf16.msra.mxu0 %v2135_v26  ;;  %s2553_s16 = smov 48   ;;  %s3105_s3 = sld [smem:[#allocation31_spill]] }
  0xcd   : > { %656 = vadd.xlane.f32.xlu0 %v655_v5  ;;  %1913 = vmatprep.subr.bf16.mxu0 %v2546_v25  ;;  %s3106_s17 = sld [smem:[#allocation35_spill]]  ;;  %s1824_s28 = sshll.u32 %s2836_s7, 3 }
  0xce   : > { %1908 = vmatpush3.bf16.msra.mxu1 %v2139_v28  ;;  %s3107_s19 = sld [smem:[#allocation42_spill]]  ;;  %s644_s20 = scalar_lea.vmem [#allocation22], %s1824_s28 }
  0xcf   : > { %1921 = vmatprep.subr.bf16.mxu1 %v2546_v25  ;;  %s1570_s14 = sshll.u32 %s644_s20, 4  ;;  %s3108_s21 = sld [smem:[#allocation43_spill]]  ;;  %s2984_s14 = int_to_ptr.vmem [resolvable:$true] %s1570_s14 }
  0xd0   : > { %s2554_s23 = smov [#allocation22]  }
  0xd1   : > { %726 = vadd.xlane.f32.xlu0 %v725_v8  ;;  %s2436_s25 = sshll.u32 %s2554_s23, 4  ;;  %s2437_s25 = int_to_ptr.vmem [resolvable:$false] %s2436_s25 }
  0xd2   : > { %s1860_s15 = sshll.u32 %s3105_s3, 7  ;;  %p2439_p13 = scmp.lt.s32.totalorder %s2984_s14, %s2437_s25 }
  0xd3   : > { %p3109_p7 = scmp.ne.s32.totalorder %s3106_s17, 0 }
 0x152   : > { %v696_v9 = vpop.xlane.xlu0 %695 }
 0x153   : > { %v698_v10 = vmul.f32 0.03125, %v696_v9  ;;  %v1829_v9 = vld [vmem:[%s3040_s10] ss:$0 sm:$0xff] }
 0x155   : > { %v699_v11 = vsub.f32 %v692_v2, %v698_v10 }
 0x156   : > { %v657_v12 = vpop.xlane.xlu0 %656 }
 0x157   : > { %v659_v13 = vmul.f32 0.03125, %v657_v12  ;;  %v700_v14 = vmul.f32 %v699_v11, %v699_v11 }
 0x159   : > { %v660_v15 = vsub.f32 %v653_v3, %v659_v13  ;;  %v701_v16 = vsel %vm654_vm0, %v700_v14, 0.0 }
 0x15a   : > { %702 = vadd.xlane.f32.xlu1 %v701_v16  ;;  %v727_v19 = vpop.xlane.xlu0 %726 }
 0x15b   : > { %v661_v17 = vmul.f32 %v660_v15, %v660_v15  ;;  %v728_v20 = vmul.f32 0.03125, %v727_v19 }
 0x15d   : > { %v662_v18 = vsel %vm654_vm0, %v661_v17, 0.0  ;;  %v729_v21 = vsub.f32 %v724_v7, %v728_v20 }
 0x15e   : > { %663 = vadd.xlane.f32.xlu1 %v662_v18 }
 0x15f   : > { %v730_v22 = vmul.f32 %v729_v21, %v729_v21 }
 0x161   : > { %v731_v23 = vsel %vm654_vm0, %v730_v22, 0.0 }
 0x162   : > { %732 = vadd.xlane.f32.xlu1 %v731_v23 }
 0x1e3   : > { %v703_v29 = vpop.xlane.xlu1 %702 }
 0x1e4   : > { %v704_v30 = vmul.f32 0.03125, %v703_v29 }
 0x1e6   : > { %v705_v31 = vadd.f32 1e-05, %v704_v30 }
 0x1e7   : > { %v664_v32 = vpop.xlane.xlu1 %663 }
 0x1e8   : > { %2144 = vrsqrt.f32 %v705_v31  ;;  %v665_v33 = vmul.f32 0.03125, %v664_v32 }
 0x1ea   : > { %v666_v34 = vadd.f32 1e-05, %v665_v33 }
 0x1eb   : > { %v733_v38 = vpop.xlane.xlu1 %732 }
 0x1ec   : > { %2146 = vrsqrt.f32 %v666_v34  ;;  %v734_v40 = vmul.f32 0.03125, %v733_v38 }
 0x1ee   : > { %v735_v43 = vadd.f32 1e-05, %v734_v40 }
 0x1f0   : > { %2148 = vrsqrt.f32 %v735_v43 }
 0x1f5   : > { %v2145_v35 = vpop.eup %2144 }
 0x1f6   : > { %v707_v37 = vmul.f32 %v2145_v35, %v699_v11 }
 0x1f8   : > { %v714_v41 = vmul.f32 %v1865_v36, %v707_v37 }
 0x1f9   : > { %v2147_v42 = vpop.eup %2146 }
 0x1fa   : > { %v668_v44 = vmul.f32 %v2147_v42, %v660_v15  ;;  %v721_v45 = vadd.f32 %v1866_v39, %v714_v41 }
 0x1fc   : > { %v675_v47 = vmul.f32 %v1865_v36, %v668_v44  ;;  %v722_v48 = vpack.c.bf16 %v721_v45, %v721_v45 }
 0x1fd   : > { %v2149_v52 = vpop.eup %2148 }
 0x1fe   : > { %v682_v49 = vadd.f32 %v1866_v39, %v675_v47  ;;  %1902 = vmatmul.mubr.msk.bf16.vlgmr.msra.gmra.mxu0 %vm654_vm0, %v722_v48  ;;  %v737_v54 = vmul.f32 %v2149_v52, %v729_v21 }
 0x1ff   : > { %1914 = vmatpush3.bf16.msra.mxu0 %v2136_v46  ;;  %1917 = vmatprep.mubr.msk.bf16.mxu0 %vm2547_vm1, %v2546_v25 }
 0x200   : > { %v683_v51 = vpack.c.bf16 %v682_v49, %v682_v49  ;;  %1915 = vmatprep.subr.bf16.mxu0 %v2546_v25  ;;  %v738_v55 = vmul.f32 %v1865_v36, %v737_v54 }
 0x202   : > { %685 = vst.msk [vmem:[#allocation2] sm:$0xf] %vm684_vm2, %v683_v51  ;;  %v739_v56 = vadd.f32 %v1866_v39, %v738_v55 }
 0x203   : > { %1916 = vmatpush3.bf16.msra.mxu0 %v2137_v50 }
 0x204   : > { %1927 = vmatprep.subr.bf16.mxu0 %v2546_v25  ;;  %v740_v57 = vpack.c.bf16 %v739_v56, %v739_v56 }
 0x206   : > { %1910 = vmatmul.mubr.msk.bf16.vlgmr.msra.gmra.mxu1 %vm654_vm0, %v740_v57 }
 0x207   : > { %1923 = vmatprep.mubr.msk.bf16.mxu1 %vm2547_vm1, %v2546_v25 }
 0x209   : > { %v914_v53 = vld [vmem:[#allocation2] sm:$0xf] }
 0x20a   : > { %1918 = vmatmul.mubr.msk.bf16.vlgmr.msra.gmra.mxu0 %vm654_vm0, %v914_v53 }
 0x20b   : > { %1929 = vmatprep.mubr.msk.bf16.mxu0 %vm2547_vm1, %v2546_v25 }
 0x2be   : > { %v801_v59 = vpop.f32.mrf.mxu0 }
 0x2bf   : > { %v802_v60 = vadd.f32 %v1825_v58, %v801_v59 }
 0x2c0   : > { %v1903_v61 = vpop.f32.mrf.mxu0 }
 0x2c1   : > { %v807_v62 = vpack.c.bf16 %v802_v60, %v802_v60 }
 0x2c2   : > { %v804_v63 = vpop.f32.mrf.mxu0 }
 0x2c3   : > { %876 = vst.msk [vmem:[#allocation3] sm:$0xf] %vm875_vm3, %v807_v62  ;;  %894 = vrot.lane.b32.xlu1 %v807_v62, %s2548_s18  ;;  %881 = vrot.lane.b32.xlu0 %v807_v62, %s2549_s24 }
 0x2c4   : > { %v1904_v0 = vpop.f32.mrf.mxu0 }
 0x2c6   : > { %v868_v11 = vpop.f32.mrf.mxu1 }
 0x2c7   : > { %904 = vrot.lane.b32.xlu1 %v807_v62, %s2550_s5  ;;  %v869_v12 = vadd.f32 %v1829_v9, %v868_v11 }
 0x2c8   : > { %v1911_v13 = vpop.f32.mrf.mxu1 }
 0x2c9   : > { %v2913_v14 = vpack.c.bf16 %v869_v12, %v869_v12 }
 0x2ca   : > { %v980_v2 = vpop.f32.mrf.mxu0  ;;  %v989_v3 = vld [vmem:[#allocation3] sm:$0xf]  ;;  %v871_v15 = vpop.f32.mrf.mxu1 }
 0x2cb   : > { %v981_v4 = vadd.f32 %v1835_v1, %v980_v2  ;;  %v998_v5 = vsel %vm993_vm4, %v989_v3, 0  ;;  %877 = vst.msk [vmem:[#allocation4] sm:$0xf] %vm875_vm3, %v2913_v14 }
 0x2cc   : > { %v1919_v6 = vpop.f32.mrf.mxu0  ;;  %1922 = vmatpush3.bf16.xpose.msra.mxu1 %v998_v5  ;;  %v1912_v16 = vpop.f32.mrf.mxu1 }
 0x2cd   : > { %v986_v7 = vpack.c.bf16 %v981_v4, %v981_v4  ;;  %1933 = vmatprep.subr.bf16.mxu1 %v2546_v25 }
 0x2ce   : > { %v983_v8 = vpop.f32.mrf.mxu0 }
 0x2cf   : > { %1221 = vrot.lane.b32.xlu0 %v986_v7, %s2548_s18  ;;  %1108 = vrot.lane.b32.xlu1 %v986_v7, %s2549_s24 }
 0x2d0   : > { %v1920_v10 = vpop.f32.mrf.mxu0 }
 0x2d2   : > { %v992_v17 = vld [vmem:[#allocation4] sm:$0xf] }
 0x2d3   : > { %1334 = vrot.lane.b32.xlu1 %v986_v7, %s2550_s5  ;;  %1924 = vmatmul.mubr.msk.bf16.vlgmr.msra.gmra.mxu1 %vm993_vm4, %v986_v7  ;;  %v1056_v18 = vsel %vm1054_vm5, %v992_v17, 0 }
 0x2d4   : > { %1935 = vmatprep.mubr.msk.bf16.mxu1 %vm2547_vm1, %v2546_v25  ;;  %1928 = vmatpush3.bf16.msra.mxu0 %v1056_v18 }
 0x2d5   : > { %1939 = vmatprep.subr.bf16.mxu0 %v2546_v25 }
 0x335   : > { %v895_v19 = vpop.permute.xlu1 %894  ;;  %v882_v20 = vpop.permute.xlu0 %881 }
 0x336   : > { %898 = vst.msk [vmem:[#allocation3 + $0x8] sm:$0xf] %vm875_vm3, %v895_v19  ;;  %885 = vst.msk [vmem:[#allocation3 + $0x4] sm:$0xf] %vm875_vm3, %v882_v20 }
 0x339   : > { %v905_v21 = vpop.permute.xlu1 %904 }
 0x33a   : > { %908 = vst.msk [vmem:[#allocation3 + $0xc] sm:$0xf] %vm875_vm3, %v905_v21 }
 0x33d   : > { %v1841_v22 = vld [vmem:[#allocation3 + $0x4] sm:$0xf]  ;;  %v1845_v24 = vld [vmem:[#allocation3 + $0x8] sm:$0xf] }
 0x33e   : > { %v1114_v23 = vsel %vm993_vm4, %v1841_v22, 0  ;;  %v1227_v27 = vsel %vm993_vm4, %v1845_v24, 0 }
 0x33f   : > { %1934 = vmatpush3.bf16.xpose.msra.mxu1 %v1114_v23 }
 0x340   : > { %1945 = vmatprep.subr.bf16.mxu1 %v2546_v25 }
 0x341   : > { %v1109_v26 = vpop.permute.xlu1 %1108  ;;  %v1849_v28 = vld [vmem:[#allocation3 + $0xc] sm:$0xf]  ;;  %v1222_v29 = vpop.permute.xlu0 %1221 }
 0x342   : > { %v1340_v30 = vsel %vm993_vm4, %v1849_v28, 0 }
 0x345   : > { %v1335_v31 = vpop.permute.xlu1 %1334 }
 0x346   : > { %1936 = vmatmul.mubr.msk.bf16.vlgmr.msra.gmra.mxu1 %vm993_vm4, %v1109_v26 }
 0x347   : > { %1946 = vmatpush3.bf16.xpose.msra.mxu1 %v1227_v27  ;;  %1947 = vmatprep.mubr.msk.bf16.mxu1 %vm2547_vm1, %v2546_v25  ;;  %v2140_v27 = vld [vmem:[#allocation20 + $0x18] sm:$0xff]  }
 0x348   : > { %1957 = vmatprep.subr.bf16.mxu1 %v2546_v25 }
 0x34e   : > { %1948 = vmatmul.mubr.msk.bf16.vlgmr.msra.gmra.mxu1 %vm993_vm4, %v1222_v29  ;;  %v2141_v29 = vld [vmem:[#allocation20 + $0x10] sm:$0xff]  }
 0x34f   : > { %1958 = vmatpush3.bf16.xpose.msra.mxu1 %v1340_v30  ;;  %1959 = vmatprep.mubr.msk.bf16.mxu1 %vm2547_vm1, %v2546_v25  ;;  %v2142_v30 = vld [vmem:[#allocation20 + $0x8] sm:$0xff]  }
 0x350   : > { %1969 = vmatprep.subr.bf16.mxu1 %v2546_v25 }
 0x356   : > { %1960 = vmatmul.mubr.msk.bf16.vlgmr.msra.gmra.mxu1 %vm993_vm4, %v1335_v31 }
 0x357   : > { %1977 = vmatprep.mubr.msk.bf16.mxu1 %vm2547_vm1, %v2546_v25  ;;  %1970 = vmatpush3.bf16.msra.mxu1 %v2140_v27 }
 0x358   : > { %1971 = vmatprep.subr.bf16.mxu1 %v2546_v25 }
 0x35b   : > { %1972 = vmatpush3.bf16.msra.mxu1 %v2141_v29 }
 0x35c   : > { %1973 = vmatprep.subr.bf16.mxu1 %v2546_v25 }
 0x35f   : > { %1974 = vmatpush3.bf16.msra.mxu1 %v2142_v30 }
 0x360   : > { %1975 = vmatprep.subr.bf16.mxu1 %v2546_v25 }
 0x393   : > { %v1034_v32 = vpop.f32.mrf.mxu1 }
 0x394   : > { %v1041_v33 = vsel %vm1040_vm6, %v1034_v32, -inf }
 0x395   : > { %1042 = vmax.xlane.f32.xlu0 %v1041_v33  ;;  %v1925_v34 = vpop.f32.mrf.mxu1 }
 0x397   : > { %v1037_v35 = vpop.f32.mrf.mxu1 }
 0x399   : > { %v1926_v36 = vpop.f32.mrf.mxu1 }
 0x406   : > { %v1150_v37 = vpop.f32.mrf.mxu1 }
 0x407   : > { %v1156_v38 = vsel %vm1040_vm6, %v1150_v37, -inf }
 0x408   : > { %1157 = vmax.xlane.f32.xlu1 %v1156_v38  ;;  %v1937_v39 = vpop.f32.mrf.mxu1 }
 0x40a   : > { %v1153_v40 = vpop.f32.mrf.mxu1 }
 0x40c   : > { %v1938_v41 = vpop.f32.mrf.mxu1 }
 0x40e   : > { %v1263_v42 = vpop.f32.mrf.mxu1 }
 0x40f   : > { %v1269_v43 = vsel %vm1040_vm6, %v1263_v42, -inf }
 0x410   : > { %1270 = vmax.xlane.f32.xlu0 %v1269_v43  ;;  %v1949_v44 = vpop.f32.mrf.mxu1 }
 0x412   : > { %v1266_v45 = vpop.f32.mrf.mxu1 }
 0x414   : > { %v1950_v46 = vpop.f32.mrf.mxu1 }
 0x416   : > { %v1376_v47 = vpop.f32.mrf.mxu1 }
 0x417   : > { %v1382_v48 = vsel %vm1040_vm6, %v1376_v47, -inf }
 0x418   : > { %1383 = vmax.xlane.f32.xlu0 %v1382_v48  ;;  %v1961_v49 = vpop.f32.mrf.mxu1 }
 0x419   : > { %899 = vrot.lane.b32.xlu1 %v2913_v14, %s2548_s18  ;;  %s2982_s18 = scalar_lea.hbm %s3108_s21, %s1860_s15 }
 0x41a   : > { %v1379_v50 = vpop.f32.mrf.mxu1 }
 0x41c   : > { %v1962_v51 = vpop.f32.mrf.mxu1 }
 0x41d   : > { %909 = vrot.lane.b32.xlu1 %v2913_v14, %s2550_s5  ;;  %s2432_s5 = scalar_lea.vmem %s2984_s14, 128 }
 0x41e   : > { %v1043_v52 = vpop.xlane.xlu0 %1042  ;;  %p2433_p2 = scmp.ne.s32.totalorder %s2984_s14, %s2432_s5 }
 0x41f   : > { %v1044_v53 = vsub.f32 %v1034_v32, %v1043_v52 }
 0x420   : > { %p2434_p8 = pnand %p2433_p2, %p3109_p7 }
 0x421   : > { %v1045_v54 = vmul.f32 1.442695, %v1044_v53 }
 0x422   : > { %p2435_p4 = pneg %p2434_p8 }
 0x423   : > { %2150 = vpow2.f32 %v1045_v54 }
 0x42e   : > { %889 = vrot.lane.b32.xlu0 %v2913_v14, %s2549_s24  ;;  %s1556_s24 = scalar_lea.sflag [#allocation7], %s2836_s7 }
 0x430   : > { %v2151_v55 = vpop.eup %2150 }
 0x431   : > { %v1050_v56 = vpack.c.bf16 %v2151_v55, %v2151_v55  ;;  %v1047_v17 = vsel %vm1040_vm6, %v2151_v55, 0.0 }
 0x433   : > { %1930 = vmatmul.mubr.msk.bf16.vlgmr.msra.gmra.mxu0 %vm1040_vm6, %v1050_v56 }
 0x434   : > { %1941 = vmatprep.mubr.msk.bf16.mxu0 %vm2547_vm1, %v2546_v25 }
 0x491   : > { %v1158_v57 = vpop.xlane.xlu1 %1157 }
 0x492   : > { %v1159_v58 = vsub.f32 %v1150_v37, %v1158_v57  ;;  %v2143_v37 = vld [vmem:[#allocation20] sm:$0xff]  }
 0x493   : > { %1976 = vmatpush3.bf16.msra.mxu1 %v2143_v37 }
 0x494   : > { %v1160_v59 = vmul.f32 1.442695, %v1159_v58 }
 0x495   : > { %v900_v60 = vpop.permute.xlu1 %899 }
 0x496   : > { %2152 = vpow2.f32 %v1160_v59  ;;  %903 = vst.msk [vmem:[#allocation4 + $0x8] sm:$0xf] %vm875_vm3, %v900_v60  ;;  %v1858_v60 = vld [vmem:[%s3107_s19] ss:$0 sm:$0xff] }
 0x499   : > { %v910_v61 = vpop.permute.xlu1 %909  ;;  %v1271_v62 = vpop.xlane.xlu0 %1270 }
 0x49a   : > { %913 = vst.msk [vmem:[#allocation4 + $0xc] sm:$0xf] %vm875_vm3, %v910_v61  ;;  %v1272_v63 = vsub.f32 %v1263_v42, %v1271_v62 }
 0x49c   : > { %v1273_v0 = vmul.f32 1.442695, %v1272_v63 }
 0x49d   : > { %v1846_v11 = vld [vmem:[#allocation4 + $0x8] sm:$0xf] }
 0x49e   : > { %2154 = vpow2.f32 %v1273_v0  ;;  %v1283_v13 = vsel %vm1054_vm5, %v1846_v11, 0 }
 0x4a1   : > { %v1384_v1 = vpop.xlane.xlu0 %1383  ;;  %v1850_v16 = vld [vmem:[#allocation4 + $0xc] sm:$0xf] }
 0x4a2   : > { %v1385_v2 = vsub.f32 %v1376_v47, %v1384_v1  ;;  %v1396_v19 = vsel %vm1054_vm5, %v1850_v16, 0 }
 0x4a3   : > { %v2153_v3 = vpop.eup %2152 }
 0x4a4   : > { %v1386_v4 = vmul.f32 1.442695, %v1385_v2  ;;  %v1162_v5 = vsel %vm1040_vm6, %v2153_v3, 0.0  ;;  %v1165_v12 = vpack.c.bf16 %v2153_v3, %v2153_v3 }
 0x4a5   : > { %1163 = vadd.xlane.f32.xlu1 %v1162_v5  ;;  %v890_v6 = vpop.permute.xlu0 %889 }
 0x4a6   : > { %2156 = vpow2.f32 %v1386_v4  ;;  %893 = vst.msk [vmem:[#allocation4 + $0x4] sm:$0xf] %vm875_vm3, %v890_v6 }
 0x4ab   : > { %v2155_v7 = vpop.eup %2154 }
 0x4ac   : > { %v1275_v8 = vsel %vm1040_vm6, %v2155_v7, 0.0  ;;  %v1278_v18 = vpack.c.bf16 %v2155_v7, %v2155_v7 }
 0x4ad   : > { %1276 = vadd.xlane.f32.xlu0 %v1275_v8  ;;  %v1842_v9 = vld [vmem:[#allocation4 + $0x4] sm:$0xf] }
 0x4ae   : > { %v1170_v10 = vsel %vm1054_vm5, %v1842_v9, 0 }
 0x4af   : > { %1940 = vmatpush3.bf16.msra.mxu0 %v1170_v10 }
 0x4b0   : > { %1951 = vmatprep.subr.bf16.mxu0 %v2546_v25 }
 0x4b2   : > { %1942 = vmatmul.mubr.msk.bf16.vlgmr.msra.gmra.mxu0 %vm1040_vm6, %v1165_v12 }
 0x4b3   : > { %v2157_v14 = vpop.eup %2156  ;;  %1952 = vmatpush3.bf16.msra.mxu0 %v1283_v13  ;;  %1953 = vmatprep.mubr.msk.bf16.mxu0 %vm2547_vm1, %v2546_v25 }
 0x4b4   : > { %v1388_v15 = vsel %vm1040_vm6, %v2157_v14, 0.0  ;;  %1963 = vmatprep.subr.bf16.mxu0 %v2546_v25  ;;  %v1391_v20 = vpack.c.bf16 %v2157_v14, %v2157_v14 }
 0x4b5   : > { %1389 = vadd.xlane.f32.xlu0 %v1388_v15 }
 0x4b9   : > { %1048 = vadd.xlane.f32.xlu0 %v1047_v17 }
 0x4ba   : > { %1954 = vmatmul.mubr.msk.bf16.vlgmr.msra.gmra.mxu0 %vm1040_vm6, %v1278_v18 }
 0x4bb   : > { %1964 = vmatpush3.bf16.msra.mxu0 %v1396_v19  ;;  %1965 = vmatprep.mubr.msk.bf16.mxu0 %vm2547_vm1, %v2546_v25 }
 0x4c2   : > { %1966 = vmatmul.mubr.msk.bf16.vlgmr.msra.gmra.mxu0 %vm1040_vm6, %v1391_v20 }
 0x4f3   : > { %v1092_v21 = vpop.f32.mrf.mxu0 }
 0x4f5   : > { %v1931_v22 = vpop.f32.mrf.mxu0 }
 0x4f7   : > { %v1095_v23 = vpop.f32.mrf.mxu0 }
 0x4f9   : > { %v1932_v24 = vpop.f32.mrf.mxu0 }
 0x52e   : > { %v1164_v26 = vpop.xlane.xlu1 %1163 }
 0x52f   : > { %2158 = vrcp.f32 %v1164_v26 }
 0x536   : > { %v1277_v28 = vpop.xlane.xlu0 %1276 }
 0x537   : > { %2160 = vrcp.f32 %v1277_v28 }
 0x53c   : > { %v2159_v31 = vpop.eup %2158 }
 0x53e   : > { %v1390_v32 = vpop.xlane.xlu0 %1389 }
 0x53f   : > { %2162 = vrcp.f32 %v1390_v32 }
 0x542   : > { %v1049_v50 = vpop.xlane.xlu0 %1048 }
 0x543   : > { %2164 = vrcp.f32 %v1049_v50 }
 0x544   : > { %v2161_v39 = vpop.eup %2160 }
 0x54c   : > { %v2163_v45 = vpop.eup %2162 }
 0x550   : > { %v2165_v51 = vpop.eup %2164 }
 0x551   : > { %v1099_v53 = vmul.f32 %v2165_v51, %v1092_v21 }
 0x572   : > { %v1206_v33 = vpop.f32.mrf.mxu0 }
 0x573   : > { %v1213_v34 = vmul.f32 %v2159_v31, %v1206_v33 }
 0x574   : > { %v1943_v35 = vpop.f32.mrf.mxu0 }
 0x575   : > { %1441 = vrot.lane.b32.xlu1 %v1213_v34, %s2551_s30  ;;  %s2438_s30 = scalar_lea.vmem %s2437_s25, 256 }
 0x576   : > { %v1209_v36 = vpop.f32.mrf.mxu0  ;;  %p2440_p1 = scmp.lt.s32.totalorder %s2438_s30, %s2432_s5 }
 0x578   : > { %v1944_v38 = vpop.f32.mrf.mxu0  ;;  %p2441_p12 = por %p2440_p1, %p2439_p13 }
 0x57a   : > { %v1319_v40 = vpop.f32.mrf.mxu0  ;;  %p2442_p3 = pnand %p2441_p12, %p2435_p4 }
 0x57b   : > { %v1326_v41 = vmul.f32 %v2161_v39, %v1319_v40 }
 0x57c   : > { %v1955_v42 = vpop.f32.mrf.mxu0 }
 0x57d   : > { %1445 = vrot.lane.b32.xlu0 %v1326_v41, %s2552_s1 }
 0x57e   : > { %v1322_v43 = vpop.f32.mrf.mxu0 }
 0x580   : > { %v1956_v44 = vpop.f32.mrf.mxu0 }
 0x582   : > { %v1432_v46 = vpop.f32.mrf.mxu0 }
 0x583   : > { %v1439_v47 = vmul.f32 %v2163_v45, %v1432_v46 }
 0x584   : > { %v1967_v48 = vpop.f32.mrf.mxu0 }
 0x585   : > { %1449 = vrot.lane.b32.xlu1 %v1439_v47, %s2553_s16 }
 0x586   : > { %v1435_v49 = vpop.f32.mrf.mxu0 }
 0x588   : > { %v1968_v25 = vpop.f32.mrf.mxu0 }
 0x5e7   : > { %v1442_v52 = vpop.permute.xlu1 %1441 }
 0x5e8   : > { %v1452_v55 = vsel %vm993_vm4, %v1099_v53, %v1442_v52 }
 0x5ef   : > { %v1446_v54 = vpop.permute.xlu0 %1445 }
 0x5f0   : > { %v1453_v56 = vsel %vm654_vm0, %v1452_v55, %v1446_v54 }
 0x5f7   : > { %v1450_v57 = vpop.permute.xlu1 %1449 }
 0x5f8   : > { %v1455_v58 = vsel %vm1454_vm7, %v1453_v56, %v1450_v57 }
 0x5f9   : > { %v1456_v59 = vpack.c.bf16 %v1455_v58, %v1455_v58 }
 0x5fb   : > { %1978 = vmatmul.mubr.msk.bf16.vlgmr.msra.gmra.mxu1 %vm1492_vm8, %v1456_v59 }
 0x6bb   : > { %v1530_v61 = vpop.f32.mrf.mxu1 }
 0x6bc   : > { %v1546_v62 = vadd.f32 %v1858_v60, %v1530_v61 }
 0x6bd   : > { %v1979_v63 = vpop.f32.mrf.mxu1 }
 0x6be   : > { %1547 = vst [vmem:[%s644_s20] sm:$0xff] %v1546_v62 }
 0x6bf   : > { %v1533_v0 = vpop.f32.mrf.mxu1 }
 0x6c0   : > { %2445 = shalt.err (!%p2442_p3)
}
 0x6c1   : > { %s2446_s1 = scalar_lea.hbm %s2982_s18, 128  ;;  %s2450_s3 = scalar_lea.hbm %s3108_s21, 256 }
 0x6c2   : > { %p2447_p9 = scmp.ne.s32.totalorder %s2982_s18, %s2446_s1  ;;  %p2451_p0 = scmp.lt.s32.totalorder %s2982_s18, %s3108_s21 }
 0x6c3   : > { %p2452_p11 = scmp.lt.s32.totalorder %s2450_s3, %s2446_s1 }
 0x6c4   : > { %p2448_p6 = pnand %p2447_p9, %p3109_p7 }
 0x6c5   : > { %p2453_p10 = por %p2452_p11, %p2451_p0 }
 0x6c6   : > { %p2449_p5 = pneg %p2448_p6 }
 0x6c8   : > { %p2454_p2 = pnand %p2453_p10, %p2449_p5 }
 0x6ca   : > { %2457 = shalt.err (!%p2454_p2)
}
 0x6cb   : > { %2015 = dma.vmem_to_hbm [thread:$0]  (%p3109_p7), %s2984_s14, 128, %s2982_s18, %s1556_s24   ;;  %v1980_v1 = vpop.f32.mrf.mxu1 }
 0x6cc PF: > { %s3110_s29 = sld [smem:[#allocation30_spill]] }
 0x6cd   : > { %s3111_s19 = sld [smem:[#allocation37_spill]] }
 0x6ce   : > { %s3112_s15 = sld [smem:[#allocation33_spill]] }
 0x6d2   : > { %s1582_s20 = sand.u32 1, %s3110_s29  }
 0x6d3   : > { %p3113_p8 = scmp.ne.s32.totalorder %s3111_s19, 0  ;;  %s1583_s22 = scalar_lea.sflag [#allocation7], %s1582_s20 }
 0x6d4   : > { %p3114_p4 = scmp.ge.s32.totalorder %s3112_s15, 2 }
 0x6d6   : > { %p2050_p13 = pnand %p3114_p4, %p3113_p8 }
 0x6d8   : > { %p2051_p1 = pneg %p2050_p13 }
 0x6da   : > { %2507 = dma.done.wait (%p2051_p1), %s1583_s22, 128  }
 0x6db   : > { %2509 = vsyncadd (%p2051_p1), %s1583_s22, 4294967168  ;;  %s36_s30 = sadd.s32 1, %s3112_s15   ;;  %s3115_s17 = sld [smem:[#allocation36_spill]] }
 0x6dc   : > { %p33_p12 = scmp.ge.s32.totalorder %s36_s30, 4   ;;  %s3116_s28 = sld [smem:[#allocation32_spill]] }
 0x6dd   : > { %s3117_s29 = sld [smem:[#allocation34_spill]]  ;;  %s3118_s25 = smov %s2516_s26 }
 0x6de   : > { %s3119_s26 = smov %s2520_s27  ;;  %35 = sbr.rel (!%p33_p12) target bundleno = 19 (0x13), region = 202 }
 0x6e1   : > { %s3120_s27 = smov %s3115_s17 }
 0x6e3   :  { %1588 = vsyncpa [#allocation6], 1 }
 0x6e4   :  { %1590 = vsyncpa [#allocation6 + $0x1], 1 }
 0x6e5   :  { %1591 = vsyncpa [#allocation9], 1 }
 0x6e6   :  { %1593 = vsyncpa [#allocation9 + $0x1], 1 }
 0x6e7   :  { %1594 = vsyncpa [#allocation12], 1 }
 0x6e8   :  { %1595 = vsyncpa [#allocation15], 1 }
 0x6e9   :  { %1596 = vsyncpa [#allocation18], 1 }
 0x6ea   :  { %1597 = vsyncpa [#allocation21], 1 }
 0x6eb   :  { %1598 = vsyncpa [#allocation7], 1 }
 0x6ec   :  { %1600 = vsyncpa [#allocation7 + $0x1], 1 }

</bundles_post_ra>
